<compile_context>
chip_gen: v7x
topology: tpu7x:2x2x1
jax: 0.10.0
libtpu: 0.0.40
codegen_flags: <defaults>
</compile_context>

<pallas_src>
import functools

import jax
import jax.numpy as jnp
from jax import lax
from jax.experimental import pallas as pl
from jax.experimental.pallas import tpu as pltpu

EPS = 1e-5
LANE = 128                       # lane-dense channel padding granularity
MATMUL_DTYPE = jnp.bfloat16      # MXU operand dtype (f32 accumulation)
ACT_DTYPE = jnp.bfloat16         # inter-layer activation storage dtype
VMEM_LIMIT = 48 * 1024 * 1024


# ---------------------------------------------------------------------------
# Fused kernel:
#   [optional prologue] BN+ReLU of the *previous* layer applied to the loaded tile (f32)
#   3x3 same-padding conv on the MXU (bf16 operands, f32 accumulation):
#     - Cin <  128: one fat-K matmul (TH*W, 9*Cin) @ (9*Cin, TC)
#     - Cin >= 128: 9 accumulating dots on shifted (TH*W, Cin) slices (no im2col patch)
#   per-tile channel sum / sum-of-squares side outputs (for this layer's BN stats)
# ---------------------------------------------------------------------------
def conv_bn_kernel(top_ref, main_ref, bot_ref, w_ref, scale_ref, shift_ref,
                   y_ref, stats_ref, *, apply_input_bn, use_fat_k):
    # top_ref/bot_ref: (1, 1, W, Cin) clamped halo rows; main_ref: (1, TH, W, Cin)
    # w_ref: (9*Cin, TC) flattened taps (bf16); scale/shift: (1, Cin) prev-layer BN (f32)
    # y_ref: (1, TH, W, TC) raw conv out (bf16); stats_ref: (1, 1, 1, 2, TC) [sum; sumsq]
    r = pl.program_id(1)
    n_r = pl.num_programs(1)

    TH = main_ref.shape[1]
    W = main_ref.shape[2]
    Cin = main_ref.shape[3]
    TC = y_ref.shape[3]

    top = top_ref[0].astype(jnp.float32)   # (1, W, Cin)
    mid = main_ref[0].astype(jnp.float32)  # (TH, W, Cin)
    bot = bot_ref[0].astype(jnp.float32)   # (1, W, Cin)

    if apply_input_bn:
        # Previous layer's BN+ReLU, fused into this conv's prologue (f32 math).
        sc = scale_ref[...]                # (1, Cin), broadcasts over rows/W
        sh = shift_ref[...]
        top = jnp.maximum(top * sc + sh, 0.0)
        mid = jnp.maximum(mid * sc + sh, 0.0)
        bot = jnp.maximum(bot * sc + sh, 0.0)

    # Halo rows were loaded with clamped indices; zero them when they fall outside the
    # image (this realises the conv's zero padding, applied AFTER BN+ReLU).
    keep_top = (r > 0).astype(jnp.float32)
    keep_bot = (r < n_r - 1).astype(jnp.float32)
    top = top * keep_top
    bot = bot * keep_bot

    # Assemble the (TH+2, W+2, Cin) zero-padded window in-kernel, then drop to bf16 for
    # the MXU. Only a single small window buffer — no 9x im2col duplication.
    win = jnp.concatenate([top, mid, bot], axis=0)          # (TH+2, W, Cin)
    zcol = jnp.zeros((TH + 2, 1, Cin), jnp.float32)
    win = jnp.concatenate([zcol, win, zcol], axis=1)        # (TH+2, W+2, Cin)
    win = win.astype(MATMUL_DTYPE)

    if use_fat_k:
        # Tiny-Cin path (first layer): fold the 9 taps into one fat-K matmul.
        cols = [win[dy:dy + TH, dx:dx + W, :].reshape(TH * W, Cin)
                for dy in range(3) for dx in range(3)]
        patch = jnp.concatenate(cols, axis=-1)              # (TH*W, 9*Cin)
        acc = jnp.dot(patch, w_ref[...],
                      preferred_element_type=jnp.float32)   # (TH*W, TC)
    else:
        # Large-Cin path: 9 accumulating MXU dots (K = Cin), no fat-K patch in VMEM.
        acc = jnp.zeros((TH * W, TC), jnp.float32)
        for dy in range(3):
            for dx in range(3):
                tap = dy * 3 + dx
                lhs = win[dy:dy + TH, dx:dx + W, :].reshape(TH * W, Cin)
                rhs = w_ref[tap * Cin:(tap + 1) * Cin, :]   # static, Cin-aligned slice
                acc = acc + jnp.dot(lhs, rhs, preferred_element_type=jnp.float32)

    # Per-tile channel statistics from the f32 accumulator (before bf16 downcast).
    # TODO(synk): for very large N*H*W, switch to a shifted / Welford-style accumulation
    # to avoid E[x^2]-E[x]^2 cancellation; fine at these scales.
    s1 = jnp.sum(acc, axis=0, keepdims=True)                # (1, TC)
    s2 = jnp.sum(acc * acc, axis=0, keepdims=True)          # (1, TC)
    stats_ref[0, 0, 0] = jnp.concatenate([s1, s2], axis=0)  # (2, TC)

    y_ref[0] = acc.reshape(TH, W, TC).astype(y_ref.dtype)


def conv_bn_layer(a, w_flat, scale, shift, *, apply_input_bn, TH, TC):
    """a: (N,H,W,Cin) raw activation; w_flat: (9*Cin, Cp) bf16. Returns conv out + stats."""
    N, H, W, Cin = a.shape
    K9, Cp = w_flat.shape
    assert K9 == 9 * Cin and H % TH == 0 and Cp % TC == 0
    nR = H // TH
    nJ = Cp // TC
    use_fat_k = Cin < 128   # keep fat-K only for the tiny-Cin first layer

    kernel = functools.partial(conv_bn_kernel,
                               apply_input_bn=apply_input_bn,
                               use_fat_k=use_fat_k)

    y, stats = pl.pallas_call(
        kernel,
        out_shape=(
            jax.ShapeDtypeStruct((N, H, W, Cp), ACT_DTYPE),
            jax.ShapeDtypeStruct((N, nR, nJ, 2, TC), jnp.float32),
        ),
        # (N, rows) outermost -> >=2-way parallel split for megacore; Cout-tile axis
        # innermost so the activation block index is unchanged across consecutive steps
        # (Pallas skips the re-DMA; only the small weight tile streams per step).
        grid=(N, nR, nJ),
        in_specs=[
            # top halo row (clamped; masked in-kernel when r == 0)
            pl.BlockSpec((1, 1, W, Cin),
                         lambda n, r, j: (n, jnp.maximum(r * TH - 1, 0), 0, 0)),
            # main TH-row tile
            pl.BlockSpec((1, TH, W, Cin), lambda n, r, j: (n, r, 0, 0)),
            # bottom halo row (clamped; masked in-kernel when r == last)
            pl.BlockSpec((1, 1, W, Cin),
                         lambda n, r, j: (n, jnp.minimum(r * TH + TH, H - 1), 0, 0)),
            # flattened conv weights for this Cout tile (bf16)
            pl.BlockSpec((K9, TC), lambda n, r, j: (0, j)),
            # previous-layer BN scale/shift (tiny, constant blocks, f32)
            pl.BlockSpec((1, Cin), lambda n, r, j: (0, 0)),
            pl.BlockSpec((1, Cin), lambda n, r, j: (0, 0)),
        ],
        out_specs=(
            pl.BlockSpec((1, TH, W, TC), lambda n, r, j: (n, r, 0, j)),
            pl.BlockSpec((1, 1, 1, 2, TC), lambda n, r, j: (n, r, j, 0, 0)),
        ),
        compiler_params=pltpu.CompilerParams(
            dimension_semantics=("parallel", "parallel", "parallel"),
            vmem_limit_bytes=VMEM_LIMIT,
        ),
    )(a, a, a, w_flat, scale, shift)
    return y, stats


# ---------------------------------------------------------------------------
# Tile-size selection: largest row tile dividing H whose per-step working set fits a
# conservative VMEM budget (double-buffered bf16 tiles + f32 window + accumulator).
# ---------------------------------------------------------------------------
def _pick_row_tile(H, W, cin, tc, budget=20 * 1024 * 1024):
    best = 1
    for th in range(1, H + 1):
        if H % th:
            continue
        act_bytes = 2 * 2 * (th + 2) * W * cin            # bf16 activations, dbl-buffered
        w_bytes = 2 * 2 * 9 * cin * tc                    # bf16 weights, dbl-buffered
        y_bytes = 2 * 2 * th * W * tc                     # bf16 conv out, dbl-buffered
        scratch = 4 * ((th + 2) * (W + 2) * cin + th * W * tc)  # f32 window + accumulator
        if act_bytes + w_bytes + y_bytes + scratch <= budget:
            best = th
    return best


def _pick_cout_tile(Cp):
    # Wider MXU tile (256) when the padded channel count allows (better fill on the
    # 256-wide MXUs of v6e/v7x); 128 otherwise (also the preferred width on v5e).
    return 256 if Cp % 256 == 0 else LANE


# ---------------------------------------------------------------------------
# DoubleConv forward (PyTorch-facing NCHW I/O).
# ---------------------------------------------------------------------------
def double_conv(x_nchw, params):
    """params: list of (w_hwio (3,3,Cin,Cout), gamma (Cout,), beta (Cout,))."""
    N, _, H, W = x_nchw.shape
    a = jnp.transpose(x_nchw, (0, 2, 3, 1)).astype(jnp.float32)   # NCHW -> NHWC (f32 input)

    # Identity "previous BN" placeholders for the first layer (unused in-kernel).
    scale = jnp.ones((1, a.shape[-1]), jnp.float32)
    shift = jnp.zeros((1, a.shape[-1]), jnp.float32)

    last_cout = params[-1][0].shape[-1]
    M = N * H * W

    for li, (w, gamma, beta) in enumerate(params):
        cin = a.shape[-1]                        # possibly channel-padded for li > 0
        _, _, wcin, cout = w.shape
        Cp = ((cout + LANE - 1) // LANE) * LANE  # lane-dense Cout (multiple of 128)
        # TODO(synk): when cout << 128 the channel padding wastes HBM bytes / MXU columns;
        # acceptable for production channel counts (>=64), mitigated here by bf16 storage.
        TC = _pick_cout_tile(Cp)
        TH = _pick_row_tile(H, W, cin, TC)

        # Zero-pad weights to (3,3,cin,Cp), flatten taps -> (9*cin, Cp), cast to bf16.
        w_p = jnp.zeros((3, 3, cin, Cp), jnp.float32).at[:, :, :wcin, :cout].set(w)
        w_flat = w_p.reshape(9 * cin, Cp).astype(MATMUL_DTYPE)

        y, stats = conv_bn_layer(a, w_flat, scale, shift,
                                 apply_input_bn=(li > 0), TH=TH, TC=TC)

        # Reduce the tiny per-tile side outputs -> batch statistics (biased var).
        ssum = stats[..., 0, :].sum(axis=(0, 1)).reshape(Cp)
        ssq = stats[..., 1, :].sum(axis=(0, 1)).reshape(Cp)
        mean = ssum / M
        var = jnp.maximum(ssq / M - mean * mean, 0.0)
        inv = lax.rsqrt(var + EPS)

        gamma_p = jnp.zeros((Cp,), jnp.float32).at[:cout].set(gamma)
        beta_p = jnp.zeros((Cp,), jnp.float32).at[:cout].set(beta)
        scale = (gamma_p * inv).reshape(1, Cp)
        shift = (beta_p - mean * gamma_p * inv).reshape(1, Cp)

        a = y  # raw bf16 conv output; its BN+ReLU is applied by the next conv's prologue

    # Final BN+ReLU + channel un-pad + NHWC->NCHW in plain jnp — XLA fuses these into a
    # single elementwise+transpose pass (no dedicated Pallas round trip over padded Cp).
    out = jnp.maximum(a.astype(jnp.float32) * scale.reshape(1, 1, 1, -1)
                      + shift.reshape(1, 1, 1, -1), 0.0)
    out = out[..., :last_cout]
    return jnp.transpose(out, (0, 3, 1, 2))     # NHWC -> NCHW


# ---------------------------------------------------------------------------
# Pure-JAX reference (NCHW, same math, fp32) for a correctness check.
# ---------------------------------------------------------------------------
def ref_double_conv(x_nchw, params):
    x = x_nchw
    for (w, gamma, beta) in params:
        w_oihw = jnp.transpose(w, (3, 2, 0, 1))
        x = lax.conv_general_dilated(
            x, w_oihw, window_strides=(1, 1), padding=((1, 1), (1, 1)),
            dimension_numbers=("NCHW", "OIHW", "NCHW"))
        mean = jnp.mean(x, axis=(0, 2, 3), keepdims=True)
        var = jnp.mean((x - mean) ** 2, axis=(0, 2, 3), keepdims=True)
        x = (x - mean) * lax.rsqrt(var + EPS)
        x = x * gamma.reshape(1, -1, 1, 1) + beta.reshape(1, -1, 1, 1)
        x = jnp.maximum(x, 0.0)
    return x


if __name__ == "__main__":
    key = jax.random.PRNGKey(0)
    in_ch, out_ch = 4, 8
    N, H, W = 2, 16, 16

    k_x, k_w1, k_w2, k_g1, k_b1, k_g2, k_b2 = jax.random.split(key, 7)
    x = jax.random.normal(k_x, (N, in_ch, H, W), jnp.float32)

    # Deterministic synthetic parameters (shapes implied by nn.Conv2d / nn.BatchNorm2d).
    w1 = jax.random.normal(k_w1, (3, 3, in_ch, out_ch), jnp.float32) * 0.1
    w2 = jax.random.normal(k_w2, (3, 3, out_ch, out_ch), jnp.float32) * 0.1
    g1 = 1.0 + 0.1 * jax.random.normal(k_g1, (out_ch,), jnp.float32)
    b1 = 0.1 * jax.random.normal(k_b1, (out_ch,), jnp.float32)
    g2 = 1.0 + 0.1 * jax.random.normal(k_g2, (out_ch,), jnp.float32)
    b2 = 0.1 * jax.random.normal(k_b2, (out_ch,), jnp.float32)

    params = [(w1, g1, b1), (w2, g2, b2)]

    out = jax.block_until_ready(double_conv(x, params))
    ref = jax.block_until_ready(ref_double_conv(x, params))

    assert out.shape == (N, out_ch, H, W), out.shape
    # Tolerance reflects intentional bf16 MXU operands + bf16 inter-layer activations
    # (f32 accumulation and f32 BN statistics throughout).
    err = float(jnp.abs(out - ref).max())
    assert jnp.allclose(out, ref, atol=3e-2, rtol=3e-2), err

    # TODO(synk): BatchNorm running_mean/running_var buffer updates (training-time side
    # effect) are not emitted; only the forward output is produced.
    print("KERNEL_OK")
</pallas_src>

<mosaic_0001>
module attributes {stable_mosaic.version = 11 : i64} {
  func.func @conv_bn_kernel(%arg0: i32, %arg1: i32, %arg2: i32, %arg3: memref<1x1x16x4xf32, #tpu.memory_space<vmem>>, %arg4: memref<1x16x16x4xf32, #tpu.memory_space<vmem>>, %arg5: memref<1x1x16x4xf32, #tpu.memory_space<vmem>>, %arg6: memref<36x128xbf16, #tpu.memory_space<vmem>>, %arg7: memref<1x4xf32, #tpu.memory_space<vmem>>, %arg8: memref<1x4xf32, #tpu.memory_space<vmem>>, %arg9: memref<1x16x16x128xbf16, #tpu.memory_space<vmem>>, %arg10: memref<1x1x1x2x128xf32, #tpu.memory_space<vmem>>) attributes {dimension_semantics = [#tpu.dimension_semantics<parallel>, #tpu.dimension_semantics<parallel>, #tpu.dimension_semantics<parallel>], iteration_bounds = array<i64: 2, 1, 1>, scalar_prefetch = 0 : i64, scratch_operands = 0 : i64, tpu.core_type = #tpu.core_type<tc>, window_params = [{transform_indices = @transform_0, window_bounds = array<i64: 1, 1, 16, 4>}, {transform_indices = @transform_1, window_bounds = array<i64: 1, 16, 16, 4>}, {transform_indices = @transform_2, window_bounds = array<i64: 1, 1, 16, 4>}, {transform_indices = @transform_3, window_bounds = array<i64: 36, 128>}, {pipeline_mode = #tpu.pipeline_mode<synchronous>, transform_indices = @transform_4, window_bounds = array<i64: 1, 4>}, {pipeline_mode = #tpu.pipeline_mode<synchronous>, transform_indices = @transform_5, window_bounds = array<i64: 1, 4>}, {transform_indices = @transform_6, window_bounds = array<i64: 1, 16, 16, 128>}, {transform_indices = @transform_7, window_bounds = array<i64: 1, 1, 1, 2, 128>}]} {
    %c0 = arith.constant 0 : index
    %c0_0 = arith.constant 0 : index
    %c0_1 = arith.constant 0 : index
    %c0_2 = arith.constant 0 : index
    %0 = vector.load %arg3[%c0, %c0_0, %c0_1, %c0_2] : memref<1x1x16x4xf32, #tpu.memory_space<vmem>>, vector<1x1x16x4xf32>
    %1 = vector.shape_cast %0 : vector<1x1x16x4xf32> to vector<1x16x4xf32>
    %c0_3 = arith.constant 0 : index
    %c0_4 = arith.constant 0 : index
    %c0_5 = arith.constant 0 : index
    %c0_6 = arith.constant 0 : index
    %2 = vector.load %arg4[%c0_3, %c0_4, %c0_5, %c0_6] : memref<1x16x16x4xf32, #tpu.memory_space<vmem>>, vector<1x16x16x4xf32>
    %3 = vector.shape_cast %2 : vector<1x16x16x4xf32> to vector<16x16x4xf32>
    %c0_7 = arith.constant 0 : index
    %c0_8 = arith.constant 0 : index
    %c0_9 = arith.constant 0 : index
    %c0_10 = arith.constant 0 : index
    %4 = vector.load %arg5[%c0_7, %c0_8, %c0_9, %c0_10] : memref<1x1x16x4xf32, #tpu.memory_space<vmem>>, vector<1x1x16x4xf32>
    %5 = vector.shape_cast %4 : vector<1x1x16x4xf32> to vector<1x16x4xf32>
    %c0_i32 = arith.constant 0 : i32
    %6 = arith.cmpi sgt, %arg1, %c0_i32 : i32
    %7 = arith.extui %6 : i1 to i32
    %8 = arith.sitofp %7 : i32 to f32
    %c0_i32_11 = arith.constant 0 : i32
    %9 = arith.cmpi slt, %arg1, %c0_i32_11 : i32
    %10 = arith.extui %9 : i1 to i32
    %11 = arith.sitofp %10 : i32 to f32
    %12 = vector.broadcast %8 : f32 to vector<1x16x4xf32>
    %13 = arith.mulf %1, %12 : vector<1x16x4xf32>
    %14 = vector.broadcast %11 : f32 to vector<1x16x4xf32>
    %15 = arith.mulf %5, %14 : vector<1x16x4xf32>
    %16 = tpu.concatenate %13, %3, %15 in 0 : vector<1x16x4xf32>, vector<16x16x4xf32>, vector<1x16x4xf32> -> vector<18x16x4xf32>
    %cst = arith.constant 0.000000e+00 : f32
    %17 = vector.broadcast %cst : f32 to vector<18x1x4xf32>
    %18 = tpu.concatenate %17, %16, %17 in 1 : vector<18x1x4xf32>, vector<18x16x4xf32>, vector<18x1x4xf32> -> vector<18x18x4xf32>
    %19 = arith.truncf %18 : vector<18x18x4xf32> to vector<18x18x4xbf16>
    %20 = vector.extract_strided_slice %19 {offsets = [0, 0, 0], sizes = [16, 16, 4], strides = [1, 1, 1]} : vector<18x18x4xbf16> to vector<16x16x4xbf16>
    %21 = vector.shape_cast %20 : vector<16x16x4xbf16> to vector<256x4xbf16>
    %22 = vector.extract_strided_slice %19 {offsets = [0, 1, 0], sizes = [16, 16, 4], strides = [1, 1, 1]} : vector<18x18x4xbf16> to vector<16x16x4xbf16>
    %23 = vector.shape_cast %22 : vector<16x16x4xbf16> to vector<256x4xbf16>
    %24 = vector.extract_strided_slice %19 {offsets = [0, 2, 0], sizes = [16, 16, 4], strides = [1, 1, 1]} : vector<18x18x4xbf16> to vector<16x16x4xbf16>
    %25 = vector.shape_cast %24 : vector<16x16x4xbf16> to vector<256x4xbf16>
    %26 = vector.extract_strided_slice %19 {offsets = [1, 0, 0], sizes = [16, 16, 4], strides = [1, 1, 1]} : vector<18x18x4xbf16> to vector<16x16x4xbf16>
    %27 = vector.shape_cast %26 : vector<16x16x4xbf16> to vector<256x4xbf16>
    %28 = vector.extract_strided_slice %19 {offsets = [1, 1, 0], sizes = [16, 16, 4], strides = [1, 1, 1]} : vector<18x18x4xbf16> to vector<16x16x4xbf16>
    %29 = vector.shape_cast %28 : vector<16x16x4xbf16> to vector<256x4xbf16>
    %30 = vector.extract_strided_slice %19 {offsets = [1, 2, 0], sizes = [16, 16, 4], strides = [1, 1, 1]} : vector<18x18x4xbf16> to vector<16x16x4xbf16>
    %31 = vector.shape_cast %30 : vector<16x16x4xbf16> to vector<256x4xbf16>
    %32 = vector.extract_strided_slice %19 {offsets = [2, 0, 0], sizes = [16, 16, 4], strides = [1, 1, 1]} : vector<18x18x4xbf16> to vector<16x16x4xbf16>
    %33 = vector.shape_cast %32 : vector<16x16x4xbf16> to vector<256x4xbf16>
    %34 = vector.extract_strided_slice %19 {offsets = [2, 1, 0], sizes = [16, 16, 4], strides = [1, 1, 1]} : vector<18x18x4xbf16> to vector<16x16x4xbf16>
    %35 = vector.shape_cast %34 : vector<16x16x4xbf16> to vector<256x4xbf16>
    %36 = vector.extract_strided_slice %19 {offsets = [2, 2, 0], sizes = [16, 16, 4], strides = [1, 1, 1]} : vector<18x18x4xbf16> to vector<16x16x4xbf16>
    %37 = vector.shape_cast %36 : vector<16x16x4xbf16> to vector<256x4xbf16>
    %38 = tpu.concatenate %21, %23, %25, %27, %29, %31, %33, %35, %37 in 1 : vector<256x4xbf16>, vector<256x4xbf16>, vector<256x4xbf16>, vector<256x4xbf16>, vector<256x4xbf16>, vector<256x4xbf16>, vector<256x4xbf16>, vector<256x4xbf16>, vector<256x4xbf16> -> vector<256x36xbf16>
    %c0_12 = arith.constant 0 : index
    %c0_13 = arith.constant 0 : index
    %39 = vector.load %arg6[%c0_12, %c0_13] : memref<36x128xbf16, #tpu.memory_space<vmem>>, vector<36x128xbf16>
    %cst_14 = arith.constant dense<0.000000e+00> : vector<256x128xf32>
    %40 = tpu.matmul %38, %39, %cst_14 {dimension_numbers = #tpu.dot_dimension_numbers<[1], [0], [0], [1], [0, 0, 1, 1], [], []>} : vector<256x36xbf16>, vector<36x128xbf16>, vector<256x128xf32> -> vector<256x128xf32>
    %cst_15 = arith.constant dense<0.000000e+00> : vector<128xf32>
    %41 = vector.multi_reduction <add>, %40, %cst_15 [0] : vector<256x128xf32> to vector<128xf32>
    %42 = vector.shape_cast %41 : vector<128xf32> to vector<1x128xf32>
    %43 = arith.mulf %40, %40 : vector<256x128xf32>
    %cst_16 = arith.constant dense<0.000000e+00> : vector<128xf32>
    %44 = vector.multi_reduction <add>, %43, %cst_16 [0] : vector<256x128xf32> to vector<128xf32>
    %45 = vector.shape_cast %44 : vector<128xf32> to vector<1x128xf32>
    %46 = tpu.concatenate %42, %45 in 0 : vector<1x128xf32>, vector<1x128xf32> -> vector<2x128xf32>
    %c0_17 = arith.constant 0 : index
    %c0_18 = arith.constant 0 : index
    %c0_19 = arith.constant 0 : index
    %c0_20 = arith.constant 0 : index
    %c0_21 = arith.constant 0 : index
    %47 = vector.load %arg10[%c0_17, %c0_18, %c0_19, %c0_20, %c0_21] : memref<1x1x1x2x128xf32, #tpu.memory_space<vmem>>, vector<1x1x1x2x128xf32>
    %48 = vector.shape_cast %47 : vector<1x1x1x2x128xf32> to vector<2x128xf32>
    %49 = vector.shape_cast %46 : vector<2x128xf32> to vector<1x1x1x2x128xf32>
    tpu.vector_store %arg10[%c0_17, %c0_18, %c0_19, %c0_20, %c0_21], %49 {strides = array<i32>} : memref<1x1x1x2x128xf32, #tpu.memory_space<vmem>>, vector<1x1x1x2x128xf32>,
    %50 = vector.shape_cast %40 : vector<256x128xf32> to vector<16x16x128xf32>
    %51 = arith.truncf %50 : vector<16x16x128xf32> to vector<16x16x128xbf16>
    %c0_22 = arith.constant 0 : index
    %c0_23 = arith.constant 0 : index
    %c0_24 = arith.constant 0 : index
    %c0_25 = arith.constant 0 : index
    %52 = vector.load %arg9[%c0_22, %c0_23, %c0_24, %c0_25] : memref<1x16x16x128xbf16, #tpu.memory_space<vmem>>, vector<1x16x16x128xbf16>
    %53 = vector.shape_cast %52 : vector<1x16x16x128xbf16> to vector<16x16x128xbf16>
    %54 = vector.shape_cast %51 : vector<16x16x128xbf16> to vector<1x16x16x128xbf16>
    tpu.vector_store %arg9[%c0_22, %c0_23, %c0_24, %c0_25], %54 {strides = array<i32>} : memref<1x16x16x128xbf16, #tpu.memory_space<vmem>>, vector<1x16x16x128xbf16>,
    return
  }
  func.func @transform_0(%arg0: i32, %arg1: i32, %arg2: i32) -> (i32, i32, i32, i32) {
    %c16_i32 = arith.constant 16 : i32
    %0 = arith.muli %arg1, %c16_i32 : i32
    %c1_i32 = arith.constant 1 : i32
    %1 = arith.subi %0, %c1_i32 : i32
    %c0_i32 = arith.constant 0 : i32
    %2 = arith.maxsi %1, %c0_i32 : i32
    %c0_i32_0 = arith.constant 0 : i32
    %c0_i32_1 = arith.constant 0 : i32
    %c0_i32_2 = arith.constant 0 : i32
    return %arg0, %2, %c0_i32_0, %c0_i32_1 : i32, i32, i32, i32
  }
  func.func @transform_1(%arg0: i32, %arg1: i32, %arg2: i32) -> (i32, i32, i32, i32) {
    %c0_i32 = arith.constant 0 : i32
    %c0_i32_0 = arith.constant 0 : i32
    %c0_i32_1 = arith.constant 0 : i32
    return %arg0, %arg1, %c0_i32, %c0_i32_0 : i32, i32, i32, i32
  }
  func.func @transform_2(%arg0: i32, %arg1: i32, %arg2: i32) -> (i32, i32, i32, i32) {
    %c16_i32 = arith.constant 16 : i32
    %0 = arith.muli %arg1, %c16_i32 : i32
    %c16_i32_0 = arith.constant 16 : i32
    %1 = arith.addi %0, %c16_i32_0 : i32
    %c15_i32 = arith.constant 15 : i32
    %2 = arith.minsi %1, %c15_i32 : i32
    %c0_i32 = arith.constant 0 : i32
    %c0_i32_1 = arith.constant 0 : i32
    %c0_i32_2 = arith.constant 0 : i32
    return %arg0, %2, %c0_i32, %c0_i32_1 : i32, i32, i32, i32
  }
  func.func @transform_3(%arg0: i32, %arg1: i32, %arg2: i32) -> (i32, i32) {
    %c0_i32 = arith.constant 0 : i32
    %c0_i32_0 = arith.constant 0 : i32
    return %c0_i32, %arg2 : i32, i32
  }
  func.func @transform_4(%arg0: i32, %arg1: i32, %arg2: i32) -> (i32, i32) {
    %c0_i32 = arith.constant 0 : i32
    %c0_i32_0 = arith.constant 0 : i32
    %c0_i32_1 = arith.constant 0 : i32
    return %c0_i32, %c0_i32_0 : i32, i32
  }
  func.func @transform_5(%arg0: i32, %arg1: i32, %arg2: i32) -> (i32, i32) {
    %c0_i32 = arith.constant 0 : i32
    %c0_i32_0 = arith.constant 0 : i32
    %c0_i32_1 = arith.constant 0 : i32
    return %c0_i32, %c0_i32_0 : i32, i32
  }
  func.func @transform_6(%arg0: i32, %arg1: i32, %arg2: i32) -> (i32, i32, i32, i32) {
    %c0_i32 = arith.constant 0 : i32
    %c0_i32_0 = arith.constant 0 : i32
    return %arg0, %arg1, %c0_i32, %arg2 : i32, i32, i32, i32
  }
  func.func @transform_7(%arg0: i32, %arg1: i32, %arg2: i32) -> (i32, i32, i32, i32, i32) {
    %c0_i32 = arith.constant 0 : i32
    %c0_i32_0 = arith.constant 0 : i32
    %c0_i32_1 = arith.constant 0 : i32
    return %arg0, %arg1, %arg2, %c0_i32, %c0_i32_0 : i32, i32, i32, i32, i32
  }
}

</mosaic_0001>

<bundles_post_ra>
// kernel: tpu_custom_call.1
= control target key start
LH: loop header
LB: loop body
LE: loop exit
PB: predicated region body
PF: predicated region fallthrough
CT: control target
= control target key end

     0   :  { %13 = vsyncpa [#allocation3], 0  ;;  %s3563_s0 = inlined_call_operand.vmem [shape: f32[2,16,16,4], index: 0, kind: input, shape index: {}]   ;;  %s3564_s1 = inlined_call_operand.vmem [shape: f32[2,16,16,4], index: 1, kind: input, shape index: {}]   ;;  %s3565_s2 = inlined_call_operand.vmem [shape: f32[2,16,16,4], index: 2, kind: input, shape index: {}]   ;;  %s3566_s3 = inlined_call_operand.vmem [shape: bf16[36,128], index: 3, kind: input, shape index: {}]   ;;  %s3567_s4 = inlined_call_operand.vmem [shape: f32[1,4], index: 4, kind: input, shape index: {}]   ;;  %s3568_s5 = inlined_call_operand.vmem [shape: f32[1,4], index: 5, kind: input, shape index: {}]   ;;  %s3569_s6 = inlined_call_operand.hbm [shape: bf16[2,16,16,128], index: 6, kind: output, shape index: {0}]   ;;  %s3570_s7 = inlined_call_operand.hbm [shape: f32[2,1,1,2,128], index: 7, kind: output, shape index: {1}]  }
   0x1   :  { %15 = vsyncpa [#allocation3 + $0x1], 0 }
   0x2   :  { %16 = vsyncpa [#allocation5], 0 }
   0x3   :  { %18 = vsyncpa [#allocation5 + $0x1], 0  ;;  %s2776_s24 = smov 0   ;;  %s2778_s25 = smov 0  }
   0x4   :  { %s2780_s26 = smov 0   ;;  %s2782_s4 = smov 0  }
   0x5   :  { %s2784_s27 = smov 0   ;;  %s2786_s5 = smov 0  }
   0x6 LB: > { %s2271_s28 = sadd.s32 4294967295, %s2723_s5   ;;  %s2272_s29 = sadd.s32 4294967294, %s2723_s5   ;;  %s2723_s5 = sphi %s2786_s5, %s24_s5   ;;  %s2719_s27 = sphi %s2784_s27, %s3577_s27   ;;  %s2715_s4 = sphi %s2782_s4, %s3576_s4   ;;  %s2711_s26 = sphi %s2780_s26, %s3575_s26   ;;  %s2707_s25 = sphi %s2778_s25, %s3574_s25   ;;  %s2703_s24 = sphi %s2776_s24, %s3573_s24  }
   0x7   : > { %s43_s30 = sadd.s32 1, %s2719_s27  ;;  %s222_s8 = sadd.s32 1, %s2711_s26 }
   0x8   : > { %p45_p0 = scmp.ge.s32.totalorder %s43_s30, 2  ;;  %p232_p1 = scmp.ne.s32.totalorder %s2711_s26, %s2707_s25 }
   0x9   : > { %p233_p2 = scmp.eq.s32.totalorder %s2271_s28, 1  ;;  %p238_p3 = scmp.ne.s32.totalorder %s2707_s25, %s2703_s24 }
   0xa   : > { %s3579_s30 = smov (%p45_p0, %s43_s30), 0  ;;  %p239_p5 = scmp.eq.s32.totalorder %s2272_s29, 1 }
   0xb   : > { %p2816_p4 = por %p233_p2, %p232_p1  ;;  %s215_s10 = ssub.s32 %s2719_s27, %s3579_s30 }
   0xc   : > { %p2276_p6 = scmp.ge.s32.totalorder %s2723_s5, 1  ;;  %p220_p7 = scmp.eq.s32.totalorder %s215_s10, 0 }
   0xd   : > { %p2823_p8 = por %p239_p5, %p238_p3  ;;  %p354_p9 = scmp.lt.s32.totalorder %s2723_s5, 3 }
   0xe   : > { %s2829_s12 = scalar_select %p220_p7, %s2711_s26, %s222_s8  }
   0xf   : > { %p355_p10 = pnand %p2276_p6, %p354_p9 }
  0x10   : > { %p430_p11 = scmp.lt.s32.totalorder (!%p355_p10), %s2715_s4, 1  ;;  %vm561_vm0 = vcmask (!%p355_p10), 1040384   ;;  %vm967_vm1 = vcmask (!%p355_p10), 1046528   ;;  %vm742_vm2 = vsmask.f32 (!%p355_p10), 7424  ;;  %s2725_s21 = smov (!%p355_p10), 12  }
  0x11   : > { %358 = sbr.rel (%p355_p10) target bundleno = 665 (0x299), region = 44  ;;  %s2726_s22 = smov (!%p355_p10), 8   ;;  %v2610_v55 = vld [vmem:[%s3566_s3] sm:$0xff] (!%p355_p10)   ;;  %vm1623_vm3 = vcmask (!%p355_p10), 1041408   ;;  %vm1306_vm4 = vcmask (!%p355_p10), 31744   ;;  %vm1339_vm5 = vcmask (!%p355_p10), 64512  }
  0x12   : > { %s2727_s23 = smov (!%p355_p10), 20   ;;  %s2728_s8 = smov (!%p355_p10), 4   ;;  %2495 = vmatprep.subr.bf16.mxu0 (!%p355_p10), %v2610_v55  ;;  %2533 = vmatprep.subr.bf16.mxu1 (!%p355_p10), %v2610_v55  ;;  %vm1372_vm6 = vcmask (!%p355_p10), 97280   ;;  %vm1405_vm7 = vcmask (!%p355_p10), 130048   ;;  %vm1438_vm8 = vcmask (!%p355_p10), 162816   ;;  %vm1471_vm9 = vcmask (!%p355_p10), 195584  }
  0x13   : > { %2496 = vmatpush3.bf16.msra.mxu0 (!%p355_p10), %v2610_v55  ;;  %2536 = vmatpush3.bf16.msra.mxu1 (!%p355_p10), %v2610_v55  ;;  %s2729_s15 = smov (!%p355_p10), 16   ;;  %s2730_s16 = smov (!%p355_p10), 24   ;;  %vm1504_vm10 = vcmask (!%p355_p10), 228352   ;;  %vm1537_vm11 = vcmask (!%p355_p10), 261120   ;;  %vm1590_vm12 = vcmask (!%p355_p10), 293888  }
  0x14   : > { %s2731_s18 = smov (!%p355_p10), 28   ;;  %s2732_s19 = smov (!%p355_p10), 32  }
  0x18   : > { %s431_s13 = scalar_select %p430_p11, %s2715_s4, 1 }
  0x1a   : > { %s2833_s14 = sshll.u32 %s431_s13, 8 }
  0x1b   : > { %s2839_s17 = scalar_lea.vmem %s3564_s1, %s2833_s14  ;;  %s438_s20 = scalar_lea.vmem %s3563_s0, %s2833_s14 }
  0x1c   : > { %v481_v0 = vld [vmem:[%s2839_s17 + $0x10] sm:$0xff]  ;;  %v482_v1 = vld [vmem:[%s2839_s17 + $0x18] sm:$0xff]  ;;  %v479_v2 = vld [vmem:[%s2839_s17] sm:$0xff]  ;;  %s2346_s29 = sadd.s32 240, %s2833_s14  ;;  %s3434_s14 = sand.u32 1, %s2707_s25  }
  0x1d   : > { %v568_v3 = vrot.slane %v481_v0, 7  ;;  %v569_v4 = vrot.slane %v482_v1, 7  ;;  %v480_v5 = vld [vmem:[%s2839_s17 + $0x8] sm:$0xff]  ;;  %v565_v6 = vrot.slane %v479_v2, 7  ;;  %v477_v7 = vld [vmem:[%s438_s20] sm:$0xff]  ;;  %s466_s13 = scalar_lea.vmem %s3565_s2, %s2346_s29  ;;  %s2733_s29 = smov [#allocation2]  }
  0x1e   : > { %v478_v8 = vld [vmem:[%s438_s20 + $0x8] sm:$0xff]  ;;  %v566_v9 = vrot.slane %v480_v5, 7  ;;  %v520_v10 = vmul.f32 0.0, %v477_v7  ;;  %v483_v36 = vld [vmem:[%s2839_s17 + $0x20] sm:$0xff]  ;;  %s2057_s20 = scalar_lea.sflag [#allocation3], %s3434_s14 }
  0x1f   : > { %v521_v11 = vmul.f32 0.0, %v478_v8  ;;  %v570_v12 = vsel %vm561_vm0, %v568_v3, %v569_v4  ;;  %v672_v13 = vsel %vm561_vm0, 0.0, %v568_v3  ;;  %v671_v14 = vsel %vm561_vm0, 0.0, %v565_v6  ;;  %v484_v37 = vld [vmem:[%s2839_s17 + $0x28] sm:$0xff] }
  0x20   : > { %v690_v15 = vsel %vm561_vm0, %v569_v4, 0.0  ;;  %v2853_v16 = vpack.c.bf16 %v570_v12, %v672_v13  ;;  %v567_v17 = vsel %vm561_vm0, %v565_v6, %v566_v9  ;;  %v689_v18 = vsel %vm561_vm0, %v566_v9, 0.0  ;;  %v2611_v2 = vld [vmem:[%s3566_s3 + $0x8] sm:$0xff]   ;;  %v485_v9 = vld [vmem:[%s2839_s17 + $0x30] sm:$0xff] }
  0x21   : > { %v711_v19 = vpack.c.bf16 %v690_v15, %v690_v15  ;;  %v2857_v20 = vpack.c.bf16 %v567_v17, %v671_v14  ;;  %v709_v21 = vpack.c.bf16 %v689_v18, %v689_v18  ;;  %v562_v22 = vrot.slane %v520_v10, 7  ;;  %2497 = vmatprep.subr.bf16.mxu0 %v2611_v2  ;;  %2534 = vmatprep.subr.bf16.mxu1 %v2611_v2  ;;  %v486_v10 = vld [vmem:[%s2839_s17 + $0x38] sm:$0xff] }
  0x22   : > { %v563_v23 = vrot.slane %v521_v11, 7  ;;  %1116 = vrot.lane.b32.xlu1 %v2853_v16, %s2725_s21  ;;  %v974_v24 = vrot.slane %v2853_v16, 1  ;;  %v768_v26 = vshrl.u32 %v2853_v16, 16  ;;  %v770_v27 = vshll.u32 %v2853_v16, 16  ;;  %2498 = vmatpush3.bf16.msra.mxu0 %v2611_v2 }
  0x23   : > { %v975_v25 = vrot.slane %v711_v19, 1  ;;  %1114 = vrot.lane.b32.xlu0 %v2857_v20, %s2725_s21  ;;  %v971_v28 = vrot.slane %v2857_v20, 1  ;;  %v972_v29 = vrot.slane %v709_v21, 1  ;;  %v756_v30 = vshrl.u32 %v2857_v20, 16  ;;  %2537 = vmatpush3.bf16.msra.mxu1 %v2611_v2 }
  0x24   : > { %v758_v31 = vshll.u32 %v2857_v20, 16  ;;  %v763_v33 = vshll.u32 %v709_v21, 16  ;;  %v564_v34 = vsel %vm561_vm0, %v562_v22, %v563_v23  ;;  %v670_v35 = vsel %vm561_vm0, 0.0, %v562_v22 }
  0x25   : > { %v2870_v32 = vsel %vm967_vm1, %v974_v24, %v975_v25  ;;  %v973_v38 = vsel %vm967_vm1, %v971_v28, %v972_v29  ;;  %v688_v40 = vsel %vm561_vm0, %v563_v23, 0.0  ;;  %v2878_v41 = vpack.c.bf16 %v564_v34, %v670_v35  ;;  %v487_v25 = vld [vmem:[%s2839_s17 + $0x40] sm:$0xff] }
  0x26   : > { %v760_v39 = vrot.slane %v758_v31, 1  ;;  %1084 = vrot.lane.b32.xlu1 %v973_v38, %s2726_s22  ;;  %v765_v42 = vrot.slane %v763_v33, 1  ;;  %v707_v43 = vpack.c.bf16 %v688_v40, %v688_v40  ;;  %v772_v44 = vrot.slane %v770_v27, 1 }
  0x27   : > { %v775_v45 = vshll.u32 %v711_v19, 16  ;;  %1178 = vrot.lane.b32.xlu0 %v973_v38, %s2727_s23  ;;  %v968_v47 = vrot.slane %v2878_v41, 1  ;;  %v571_v48 = vrot.slane %v483_v36, 7  ;;  %v572_v49 = vrot.slane %v484_v37, 7 }
  0x28   : > { %v761_v46 = vor.u32 %v760_v39, %v756_v30  ;;  %v969_v50 = vrot.slane %v707_v43, 1  ;;  %v746_v54 = vshll.u32 %v2878_v41, 16  ;;  %v773_v56 = vor.u32 %v772_v44, %v768_v26  ;;  %v488_v26 = vld [vmem:[%s2839_s17 + $0x48] sm:$0xff] }
  0x29   : > { %v573_v52 = vsel %vm561_vm0, %v571_v48, %v572_v49  ;;  %v673_v53 = vsel %vm561_vm0, 0.0, %v571_v48  ;;  %v777_v59 = vrot.slane %v775_v45, 1  ;;  %v744_v60 = vshrl.u32 %v2878_v41, 16 }
  0x2a   : > { %v766_v51 = vsel %vm742_vm2, %v761_v46, %v765_v42  ;;  %1180 = vrot.lane.b32.xlu1 %v2870_v32, %s2727_s23  ;;  %v2892_v57 = vpack.c.bf16 %v573_v52, %v673_v53  ;;  %v970_v58 = vsel %vm967_vm1, %v968_v47, %v969_v50  ;;  %v691_v61 = vsel %vm561_vm0, %v572_v49, 0.0  ;;  %v2612_v42 = vld [vmem:[%s3566_s3 + $0x10] ss:$0 sps:$4 sm:$0x33]  }
  0x2b   : > { %1052 = vrot.lane.b32.xlu0 %v766_v51, %s2728_s8  ;;  %v748_v62 = vrot.slane %v746_v54, 1  ;;  %v751_v63 = vshll.u32 %v707_v43, 16  ;;  %v713_v0 = vpack.c.bf16 %v691_v61, %v691_v61  ;;  %v778_v3 = vsel %vm742_vm2, %v773_v56, %v777_v59  ;;  %2539 = vmatprep.subr.msk.bf16.mxu0 %vm1623_vm3, %v2612_v42  ;;  %v489_v53 = vld [vmem:[%s2839_s17 + $0x50] sm:$0xff]  ;;  %v490_v54 = vld [vmem:[%s2839_s17 + $0x58] sm:$0xff] }
  0x2c   : > { %v782_v1 = vshll.u32 %v2892_v57, 16  ;;  %v780_v4 = vshrl.u32 %v2892_v57, 16  ;;  %v574_v14 = vrot.slane %v485_v9, 7  ;;  %v575_v15 = vrot.slane %v486_v10, 7  ;;  %2540 = vmatprep.subr.msk.bf16.mxu1 %vm1623_vm3, %v2612_v42 }
  0x2d   : > { %v787_v6 = vshll.u32 %v713_v0, 16  ;;  %v749_v7 = vor.u32 %v748_v62, %v744_v60  ;;  %v753_v8 = vrot.slane %v751_v63, 1  ;;  %v977_v22 = vrot.slane %v2892_v57, 1 }
  0x2e   : > { %1082 = vrot.lane.b32.xlu1 %v970_v58, %s2726_s22  ;;  %v784_v5 = vrot.slane %v782_v1, 1  ;;  %v576_v18 = vsel %vm561_vm0, %v574_v14, %v575_v15  ;;  %v674_v19 = vsel %vm561_vm0, 0.0, %v574_v14  ;;  %v978_v23 = vrot.slane %v713_v0, 1 }
  0x2f   : > { %1146 = vrot.lane.b32.xlu0 %v766_v51, %s2729_s15  ;;  %v789_v12 = vrot.slane %v787_v6, 1  ;;  %v754_v13 = vsel %vm742_vm2, %v749_v7, %v753_v8  ;;  %v2920_v21 = vpack.c.bf16 %v576_v18, %v674_v19  ;;  %v692_v24 = vsel %vm561_vm0, %v575_v15, 0.0 }
  0x30   : > { %v785_v11 = vor.u32 %v784_v5, %v780_v4  ;;  %v715_v27 = vpack.c.bf16 %v692_v24, %v692_v24  ;;  %v979_v29 = vsel %vm967_vm1, %v977_v22, %v978_v23  ;;  %v577_v30 = vrot.slane %v487_v25, 7  ;;  %v492_v4 = vld [vmem:[%s2839_s17 + $0x68] sm:$0xff] }
  0x31   : > { %v794_v28 = vshll.u32 %v2920_v21, 16  ;;  %v578_v31 = vrot.slane %v488_v26, 7  ;;  %v792_v33 = vshrl.u32 %v2920_v21, 16  ;;  %v980_v44 = vrot.slane %v2920_v21, 1 }
  0x32   : > { %1148 = vrot.lane.b32.xlu1 %v778_v3, %s2729_s15  ;;  %v790_v17 = vsel %vm742_vm2, %v785_v11, %v789_v12  ;;  %v799_v35 = vshll.u32 %v715_v27, 16  ;;  %v675_v37 = vsel %vm561_vm0, 0.0, %v577_v30  ;;  %v981_v45 = vrot.slane %v715_v27, 1 }
  0x33   : > { %1210 = vrot.lane.b32.xlu0 %v2853_v16, %s2730_s16  ;;  %v796_v34 = vrot.slane %v794_v28, 1  ;;  %v579_v36 = vsel %vm561_vm0, %v577_v30, %v578_v31  ;;  %v693_v43 = vsel %vm561_vm0, %v578_v31, 0.0  ;;  %v1625_v48 = vsel %vm1623_vm3, %v2612_v42, 0  ;;  %v493_v31 = vld [vmem:[%s2839_s17 + $0x70] sm:$0xff] }
  0x34   : > { %v801_v39 = vrot.slane %v799_v35, 1  ;;  %v2939_v40 = vpack.c.bf16 %v579_v36, %v675_v37  ;;  %v717_v46 = vpack.c.bf16 %v693_v43, %v693_v43  ;;  %2500 = vmatpush3.bf16.msra.mxu0 %v1625_v48  ;;  %2538 = vmatpush3.bf16.msra.mxu1 %v1625_v48  ;;  %v982_v49 = vsel %vm967_vm1, %v980_v44, %v981_v45 }
  0x35   : > { %v797_v38 = vor.u32 %v796_v34, %v792_v33  ;;  %v580_v58 = vrot.slane %v489_v53, 7  ;;  %v581_v59 = vrot.slane %v490_v54, 7  ;;  %v584_v9 = vrot.slane %v492_v4, 7  ;;  %v494_v33 = vld [vmem:[%s2839_s17 + $0x78] sm:$0xff] }
  0x36   : > { %1212 = vrot.lane.b32.xlu1 %v2892_v57, %s2730_s16  ;;  %v806_v47 = vshll.u32 %v2939_v40, 16  ;;  %v804_v50 = vshrl.u32 %v2939_v40, 16  ;;  %v811_v52 = vshll.u32 %v717_v46, 16  ;;  %v983_v0 = vrot.slane %v2939_v40, 1 }
  0x37   : > { %1050 = vrot.lane.b32.xlu0 %v754_v13, %s2728_s8  ;;  %v582_v61 = vsel %vm561_vm0, %v580_v58, %v581_v59  ;;  %v676_v62 = vsel %vm561_vm0, 0.0, %v580_v58  ;;  %v984_v1 = vrot.slane %v717_v46, 1  ;;  %v694_v2 = vsel %vm561_vm0, %v581_v59, 0.0  ;;  %v495_v46 = vld [vmem:[%s2839_s17 + $0x80] sm:$0xff] }
  0x38   : > { %v808_v51 = vrot.slane %v806_v47, 1  ;;  %v813_v56 = vrot.slane %v811_v52, 1  ;;  %v2969_v63 = vpack.c.bf16 %v582_v61, %v676_v62  ;;  %v719_v5 = vpack.c.bf16 %v694_v2, %v694_v2  ;;  %v496_v47 = vld [vmem:[%s2839_s17 + $0x88] sm:$0xff] }
  0x39   : > { %v985_v7 = vsel %vm967_vm1, %v983_v0, %v984_v1  ;;  %v695_v19 = vsel %vm561_vm0, %v584_v9, 0.0  ;;  %v586_v36 = vrot.slane %v493_v31, 7  ;;  %v587_v37 = vrot.slane %v494_v33, 7  ;;  %v499_v33 = vld [vmem:[%s2839_s17 + $0xa0] sm:$0xff] }
  0x3a   : > { %1244 = vrot.lane.b32.xlu1 %v790_v17, %s2731_s18  ;;  %v809_v55 = vor.u32 %v808_v51, %v804_v50  ;;  %v818_v6 = vshll.u32 %v2969_v63, 16  ;;  %v816_v10 = vshrl.u32 %v2969_v63, 16  ;;  %v823_v12 = vshll.u32 %v719_v5, 16 }
  0x3b   : > { %1242 = vrot.lane.b32.xlu0 %v778_v3, %s2731_s18  ;;  %v986_v22 = vrot.slane %v2969_v63, 1  ;;  %v987_v24 = vrot.slane %v719_v5, 1  ;;  %v721_v25 = vpack.c.bf16 %v695_v19, %v695_v19  ;;  %v678_v42 = vsel %vm561_vm0, 0.0, %v586_v36 }
  0x3c   : > { %v814_v60 = vsel %vm742_vm2, %v809_v55, %v813_v56  ;;  %v820_v11 = vrot.slane %v818_v6, 1  ;;  %v589_v51 = vrot.slane %v495_v46, 7  ;;  %v590_v52 = vrot.slane %v496_v47, 7 }
  0x3d   : > { %v988_v27 = vsel %vm967_vm1, %v986_v22, %v987_v24  ;;  %v835_v30 = vshll.u32 %v721_v25, 16  ;;  %v990_v45 = vrot.slane %v721_v25, 1 }
  0x3e   : > { %1054 = vrot.lane.b32.xlu1 %v778_v3, %s2728_s8  ;;  %v491_v3 = vld [vmem:[%s2839_s17 + $0x60] sm:$0xff]  ;;  %v821_v15 = vor.u32 %v820_v11, %v816_v10  ;;  %v591_v56 = vsel %vm561_vm0, %v589_v51, %v590_v52  ;;  %v679_v58 = vsel %vm561_vm0, 0.0, %v589_v51  ;;  %v697_v62 = vsel %vm561_vm0, %v590_v52, 0.0  ;;  %v498_v10 = vld [vmem:[%s2839_s17 + $0x98] sm:$0xff] }
  0x3f   : > { %1274 = vrot.lane.b32.xlu0 %v2870_v32, %s2732_s19  ;;  %v583_v8 = vrot.slane %v491_v3, 7  ;;  %v837_v35 = vrot.slane %v835_v30, 1  ;;  %v3030_v61 = vpack.c.bf16 %v591_v56, %v679_v58  ;;  %v725_v3 = vpack.c.bf16 %v697_v62, %v697_v62 }
  0x41   : > { %v585_v13 = vsel %vm561_vm0, %v583_v8, %v584_v9  ;;  %v677_v14 = vsel %vm561_vm0, 0.0, %v583_v8  ;;  %v854_v4 = vshll.u32 %v3030_v61, 16  ;;  %v852_v6 = vshrl.u32 %v3030_v61, 16  ;;  %v497_v9 = vld [vmem:[%s2839_s17 + $0x90] sm:$0xff] }
  0x42   : > { %1056 = vrot.lane.b32.xlu1 %v790_v17, %s2728_s8  ;;  %v2986_v18 = vpack.c.bf16 %v585_v13, %v677_v14  ;;  %v859_v8 = vshll.u32 %v725_v3, 16  ;;  %v592_v14 = vrot.slane %v497_v9, 7 }
  0x43   : > { %1276 = vrot.lane.b32.xlu0 %v979_v29, %s2732_s19 }
  0x44   : > { %v830_v26 = vshll.u32 %v2986_v18, 16  ;;  %v828_v28 = vshrl.u32 %v2986_v18, 16  ;;  %v989_v44 = vrot.slane %v2986_v18, 1  ;;  %v680_v24 = vsel %vm561_vm0, 0.0, %v592_v14 }
  0x46   : > { %1088 = vrot.lane.b32.xlu1 %v979_v29, %s2726_s22  ;;  %v991_v50 = vsel %vm967_vm1, %v989_v44, %v990_v45 }
  0x47   : > { %1086 = vrot.lane.b32.xlu0 %v2870_v32, %s2726_s22  ;;  %v802_v32 = vsel %vm742_vm2, %v797_v38, %v801_v39  ;;  %v588_v39 = vsel %vm561_vm0, %v586_v36, %v587_v37 }
  0x48   : > { %v3013_v43 = vpack.c.bf16 %v588_v39, %v678_v42  ;;  %v595_v39 = vrot.slane %v499_v33, 7 }
  0x4a   : > { %1120 = vrot.lane.b32.xlu1 %v2920_v21, %s2725_s21  ;;  %v840_v53 = vshrl.u32 %v3013_v43, 16  ;;  %v992_v0 = vrot.slane %v3013_v43, 1 }
  0x4b   : > { %1118 = vrot.lane.b32.xlu0 %v2892_v57, %s2725_s21 }
  0x4e   : > { %1152 = vrot.lane.b32.xlu1 %v802_v32, %s2729_s15 }
  0x4f   : > { %1150 = vrot.lane.b32.xlu0 %v790_v17, %s2729_s15  ;;  %v825_v17 = vrot.slane %v823_v12, 1  ;;  %v861_v12 = vrot.slane %v859_v8, 1 }
  0x51   : > { %v826_v23 = vsel %vm742_vm2, %v821_v15, %v825_v17  ;;  %v593_v15 = vrot.slane %v498_v10, 7 }
  0x52   : > { %1184 = vrot.lane.b32.xlu1 %v982_v49, %s2727_s23 }
  0x53   : > { %1182 = vrot.lane.b32.xlu0 %v979_v29, %s2727_s23  ;;  %v832_v29 = vrot.slane %v830_v26, 1  ;;  %v698_v30 = vsel %vm561_vm0, %v593_v15, 0.0 }
  0x55   : > { %v833_v34 = vor.u32 %v832_v29, %v828_v28  ;;  %v995_v28 = vrot.slane %v3030_v61, 1  ;;  %v996_v29 = vrot.slane %v725_v3, 1 }
  0x56   : > { %1216 = vrot.lane.b32.xlu1 %v2939_v40, %s2730_s16 }
  0x57   : > { %1214 = vrot.lane.b32.xlu0 %v2920_v21, %s2730_s16  ;;  %v838_v38 = vsel %vm742_vm2, %v833_v34, %v837_v35  ;;  %v500_v34 = vld [vmem:[%s2839_s17 + $0xa8] sm:$0xff]  ;;  %v727_v35 = vpack.c.bf16 %v698_v30, %v698_v30 }
  0x58   : > { %v596_v42 = vrot.slane %v500_v34, 7 }
  0x59   : > { %v871_v46 = vshll.u32 %v727_v35, 16  ;;  %v999_v62 = vrot.slane %v727_v35, 1 }
  0x5a   : > { %1248 = vrot.lane.b32.xlu1 %v814_v60, %s2731_s18 }
  0x5b   : > { %1246 = vrot.lane.b32.xlu0 %v802_v32, %s2731_s18  ;;  %v873_v52 = vrot.slane %v871_v46, 1 }
  0x5e   : > { %1058 = vrot.lane.b32.xlu1 %v802_v32, %s2728_s8  ;;  %v696_v32 = vsel %vm561_vm0, %v587_v37, 0.0 }
  0x5f   : > { %1278 = vrot.lane.b32.xlu0 %v982_v49, %s2732_s19  ;;  %v723_v48 = vpack.c.bf16 %v696_v32, %v696_v32 }
  0x61   : > { %v847_v55 = vshll.u32 %v723_v48, 16  ;;  %v993_v2 = vrot.slane %v723_v48, 1  ;;  %v597_v48 = vsel %vm561_vm0, %v595_v39, %v596_v42 }
  0x62   : > { %1060 = vrot.lane.b32.xlu1 %v814_v60, %s2728_s8 }
  0x63   : > { %1280 = vrot.lane.b32.xlu0 %v985_v7, %s2732_s19  ;;  %v994_v5 = vsel %vm967_vm1, %v992_v0, %v993_v2 }
  0x66   : > { %1092 = vrot.lane.b32.xlu1 %v985_v7, %s2726_s22 }
  0x67   : > { %1090 = vrot.lane.b32.xlu0 %v982_v49, %s2726_s22  ;;  %v842_v49 = vshll.u32 %v3013_v43, 16 }
  0x69   : > { %v844_v54 = vrot.slane %v842_v49, 1  ;;  %v681_v49 = vsel %vm561_vm0, 0.0, %v595_v39 }
  0x6a   : > { %1124 = vrot.lane.b32.xlu1 %v2969_v63, %s2725_s21 }
  0x6b   : > { %1122 = vrot.lane.b32.xlu0 %v2939_v40, %s2725_s21  ;;  %v845_v59 = vor.u32 %v844_v54, %v840_v53  ;;  %v3086_v53 = vpack.c.bf16 %v597_v48, %v681_v49 }
  0x6d   : > { %v876_v9 = vshrl.u32 %v3086_v53, 16  ;;  %v1001_v46 = vrot.slane %v3086_v53, 1 }
  0x6e   : > { %1156 = vrot.lane.b32.xlu1 %v826_v23, %s2729_s15 }
  0x6f   : > { %1154 = vrot.lane.b32.xlu0 %v814_v60, %s2729_s15  ;;  %v849_v60 = vrot.slane %v847_v55, 1  ;;  %v699_v55 = vsel %vm561_vm0, %v596_v42, 0.0 }
  0x70   : > { %v3100_v2 = vpack.c.bf16 %v699_v55, %v699_v55 }
  0x71   : > { %v850_v1 = vsel %vm742_vm2, %v845_v59, %v849_v60 }
  0x72   : > { %1188 = vrot.lane.b32.xlu1 %v988_v27, %s2727_s23 }
  0x73   : > { %1186 = vrot.lane.b32.xlu0 %v985_v7, %s2727_s23  ;;  %v856_v7 = vrot.slane %v854_v4, 1 }
  0x75   : > { %v857_v11 = vor.u32 %v856_v7, %v852_v6 }
  0x76   : > { %1220 = vrot.lane.b32.xlu1 %v2986_v18, %s2730_s16 }
  0x77   : > { %1218 = vrot.lane.b32.xlu0 %v2969_v63, %s2730_s16  ;;  %v3055_v19 = vsel %vm742_vm2, %v857_v11, %v861_v12 }
  0x7a   : > { %1252 = vrot.lane.b32.xlu1 %v838_v38, %s2731_s18 }
  0x7b   : > { %1250 = vrot.lane.b32.xlu0 %v826_v23, %s2731_s18 }
  0x7e   : > { %1062 = vrot.lane.b32.xlu1 %v826_v23, %s2728_s8  ;;  %v594_v23 = vsel %vm561_vm0, %v592_v14, %v593_v15  ;;  %v883_v14 = vshll.u32 %v3100_v2, 16 }
  0x7f   : > { %1282 = vrot.lane.b32.xlu0 %v988_v27, %s2732_s19  ;;  %v3062_v26 = vpack.c.bf16 %v594_v23, %v680_v24  ;;  %v501_v24 = vld [vmem:[%s2839_s17 + $0xb0] sm:$0xff] }
  0x80   : > { %v598_v33 = vrot.slane %v501_v24, 7 }
  0x81   : > { %v866_v36 = vshll.u32 %v3062_v26, 16  ;;  %v864_v45 = vshrl.u32 %v3062_v26, 16  ;;  %v998_v60 = vrot.slane %v3062_v26, 1 }
  0x82   : > { %1064 = vrot.lane.b32.xlu1 %v838_v38, %s2728_s8  ;;  %v682_v42 = vsel %vm561_vm0, 0.0, %v598_v33 }
  0x83   : > { %1284 = vrot.lane.b32.xlu0 %v991_v50, %s2732_s19  ;;  %v868_v32 = vrot.slane %v866_v36, 1  ;;  %v3109_v8 = vsel %vm967_vm1, %v998_v60, %v999_v62 }
  0x85   : > { %v869_v51 = vor.u32 %v868_v32, %v864_v45 }
  0x86   : > { %1096 = vrot.lane.b32.xlu1 %v991_v50, %s2726_s22 }
  0x87   : > { %1094 = vrot.lane.b32.xlu0 %v988_v27, %s2726_s22 }
  0x8a   : > { %1128 = vrot.lane.b32.xlu1 %v3013_v43, %s2725_s21 }
  0x8b   : > { %1126 = vrot.lane.b32.xlu0 %v2986_v18, %s2725_s21 }
  0x8e   : > { %1160 = vrot.lane.b32.xlu1 %v850_v1, %s2729_s15 }
  0x8f   : > { %1158 = vrot.lane.b32.xlu0 %v838_v38, %s2729_s15  ;;  %v3074_v38 = vsel %vm967_vm1, %v995_v28, %v996_v29  ;;  %v885_v29 = vrot.slane %v883_v14, 1 }
  0x92   : > { %1192 = vrot.lane.b32.xlu1 %v994_v5, %s2727_s23 }
  0x93   : > { %1190 = vrot.lane.b32.xlu0 %v991_v50, %s2727_s23 }
  0x94   : > { %v3048_v13 = vpop.permute.xlu1 %1116 }
  0x95   : > { %v1115_v17 = vpop.permute.xlu0 %1114 }
  0x96   : > { %1224 = vrot.lane.b32.xlu1 %v3030_v61, %s2730_s16 }
  0x97   : > { %1222 = vrot.lane.b32.xlu0 %v3013_v43, %s2730_s16 }
  0x98   : > { %v1085_v22 = vpop.permute.xlu1 %1084 }
  0x99   : > { %v1179_v25 = vpop.permute.xlu0 %1178 }
  0x9a   : > { %1256 = vrot.lane.b32.xlu1 %v3055_v19, %s2731_s18 }
  0x9b   : > { %1254 = vrot.lane.b32.xlu0 %v850_v1, %s2731_s18 }
  0x9c   : > { %v3064_v27 = vpop.permute.xlu1 %1180 }
  0x9d   : > { %v1053_v31 = vpop.permute.xlu0 %1052 }
  0x9e   : > { %1066 = vrot.lane.b32.xlu1 %v850_v1, %s2728_s8  ;;  %v1310_v56 = vsel %vm1306_vm4, %v2857_v20, %v1053_v31  ;;  %v874_v1 = vsel %vm742_vm2, %v869_v51, %v873_v52  ;;  %v878_v20 = vshll.u32 %v3086_v53, 16  ;;  %v504_v51 = vld [vmem:[%s2839_s17 + $0xc8] sm:$0xff] }
  0x9f   : > { %1286 = vrot.lane.b32.xlu0 %v994_v5, %s2732_s19  ;;  %v1343_v3 = vsel %vm1339_vm5, %v1310_v56, %v1085_v22 }
  0xa0   : > { %v1083_v37 = vpop.permute.xlu1 %1082  ;;  %v1376_v10 = vsel %vm1372_vm6, %v1343_v3, %v3048_v13  ;;  %v880_v12 = vrot.slane %v878_v20, 1 }
  0xa1   : > { %v1147_v44 = vpop.permute.xlu0 %1146 }
  0xa2   : > { %1068 = vrot.lane.b32.xlu1 %v3055_v19, %s2728_s8  ;;  %v881_v28 = vor.u32 %v880_v12, %v876_v9 }
  0xa3   : > { %1288 = vrot.lane.b32.xlu0 %v3074_v38, %s2732_s19 }
  0xa4   : > { %v1149_v47 = vpop.permute.xlu1 %1148 }
  0xa5   : > { %v1211_v50 = vpop.permute.xlu0 %1210  ;;  %v1409_v15 = vsel %vm1405_vm7, %v1376_v10, %v1149_v47  ;;  %v1002_v47 = vrot.slane %v3100_v2, 1 }
  0xa6   : > { %1100 = vrot.lane.b32.xlu1 %v3074_v38, %s2726_s22 }
  0xa7   : > { %1098 = vrot.lane.b32.xlu0 %v994_v5, %s2726_s22  ;;  %v1003_v56 = vsel %vm967_vm1, %v1001_v46, %v1002_v47 }
  0xa8   : > { %v1213_v54 = vpop.permute.xlu1 %1212 }
  0xa9   : > { %v1051_v58 = vpop.permute.xlu0 %1050 }
  0xaa   : > { %v1308_v59 = vsel %vm1306_vm4, %v2878_v41, %v1051_v58  ;;  %1132 = vrot.lane.b32.xlu1 %v3062_v26, %s2725_s21 }
  0xab   : > { %v1341_v0 = vsel %vm1339_vm5, %v1308_v59, %v1083_v37  ;;  %1130 = vrot.lane.b32.xlu0 %v3030_v61, %s2725_s21  ;;  %v602_v59 = vrot.slane %v504_v51, 7 }
  0xac   : > { %v1374_v41 = vsel %vm1372_vm6, %v1341_v0, %v1115_v17  ;;  %v1245_v4 = vpop.permute.xlu1 %1244 }
  0xad   : > { %v1407_v5 = vsel %vm1405_vm7, %v1374_v41, %v1147_v44  ;;  %v1243_v6 = vpop.permute.xlu0 %1242  ;;  %v701_v9 = vsel %vm561_vm0, %v602_v59, 0.0 }
  0xae   : > { %v1440_v7 = vsel %vm1438_vm8, %v1407_v5, %v1179_v25  ;;  %1164 = vrot.lane.b32.xlu1 %v874_v1, %s2729_s15  ;;  %v502_v25 = vld [vmem:[%s2839_s17 + $0xb8] sm:$0xff] }
  0xaf   : > { %v1473_v11 = vsel %vm1471_vm9, %v1440_v7, %v1211_v50  ;;  %1162 = vrot.lane.b32.xlu0 %v3055_v19, %s2729_s15  ;;  %v1442_v19 = vsel %vm1438_vm8, %v1409_v15, %v3064_v27  ;;  %v599_v34 = vrot.slane %v502_v25, 7  ;;  %v886_v27 = vsel %vm742_vm2, %v881_v28, %v885_v29  ;;  %v503_v50 = vld [vmem:[%s2839_s17 + $0xc0] sm:$0xff] }
  0xb0   : > { %v1506_v17 = vsel %vm1504_vm10, %v1473_v11, %v1243_v6  ;;  %v3120_v22 = vpop.permute.xlu1 %1054  ;;  %v1475_v30 = vsel %vm1471_vm9, %v1442_v19, %v1213_v54  ;;  %v601_v58 = vrot.slane %v503_v50, 7  ;;  %v3179_v15 = vpack.c.bf16 %v701_v9, %v701_v9 }
  0xb1   : > { %v1275_v23 = vpop.permute.xlu0 %1274  ;;  %v1508_v35 = vsel %vm1504_vm10, %v1475_v30, %v1245_v4  ;;  %v600_v39 = vsel %vm561_vm0, %v598_v33, %v599_v34  ;;  %v700_v48 = vsel %vm561_vm0, %v599_v34, 0.0  ;;  %v1312_v14 = vsel %vm1306_vm4, %v2853_v16, %v3120_v22 }
  0xb2   : > { %1196 = vrot.lane.b32.xlu1 %v3109_v8, %s2727_s23  ;;  %v1539_v13 = vsel %vm1537_vm11, %v1506_v17, %v1275_v23  ;;  %v3147_v45 = vpack.c.bf16 %v600_v39, %v682_v42  ;;  %v731_v52 = vpack.c.bf16 %v700_v48, %v700_v48  ;;  %v603_v20 = vsel %vm561_vm0, %v601_v58, %v602_v59 }
  0xb3   : > { %1194 = vrot.lane.b32.xlu0 %v3074_v38, %s2727_s23  ;;  %2501 = vmatprep.mubr.msk.bf16.mxu0 %vm1590_vm12, %v1539_v13  ;;  %v683_v3 = vsel %vm561_vm0, 0.0, %v601_v58  ;;  %v907_v33 = vshll.u32 %v3179_v15, 16 }
  0xb4   : > { %v3133_v31 = vpop.permute.xlu1 %1056  ;;  %v890_v54 = vshll.u32 %v3147_v45, 16  ;;  %v888_v62 = vshrl.u32 %v3147_v45, 16  ;;  %v3167_v6 = vpack.c.bf16 %v603_v20, %v683_v3  ;;  %v1004_v11 = vrot.slane %v3147_v45, 1 }
  0xb5   : > { %v1277_v36 = vpop.permute.xlu0 %1276  ;;  %v1005_v12 = vrot.slane %v731_v52, 1  ;;  %v1314_v28 = vsel %vm1306_vm4, %v2892_v57, %v3133_v31  ;;  %v506_v57 = vld [vmem:[%s2839_s17 + $0xd8] sm:$0xff] }
  0xb6   : > { %v1541_v37 = vsel %vm1537_vm11, %v1508_v35, %v1277_v36  ;;  %1228 = vrot.lane.b32.xlu1 %v3086_v53, %s2730_s16  ;;  %v892_v0 = vrot.slane %v890_v54, 1  ;;  %v902_v17 = vshll.u32 %v3167_v6, 16  ;;  %v900_v22 = vshrl.u32 %v3167_v6, 16 }
  0xb7   : > { %1226 = vrot.lane.b32.xlu0 %v3062_v26, %s2730_s16  ;;  %2502 = vmatmul.mubr.msk.bf16.vlgmr.msra.gmra.mrb[0].mxu0 %vm1590_vm12, %v1541_v37  ;;  %v3187_v16 = vsel %vm967_vm1, %v1004_v11, %v1005_v12  ;;  %v605_v50 = vrot.slane %v506_v57, 7 }
  0xb8   : > { %v1089_v38 = vpop.permute.xlu1 %1088  ;;  %v893_v4 = vor.u32 %v892_v0, %v888_v62  ;;  %v904_v30 = vrot.slane %v902_v17, 1 }
  0xb9   : > { %v1087_v44 = vpop.permute.xlu0 %1086  ;;  %v1347_v34 = vsel %vm1339_vm5, %v1314_v28, %v1089_v38  ;;  %v702_v20 = vsel %vm561_vm0, %v605_v50, 0.0 }
  0xba   : > { %1260 = vrot.lane.b32.xlu1 %v886_v27, %s2731_s18  ;;  %v1345_v23 = vsel %vm1339_vm5, %v1312_v14, %v1087_v44  ;;  %v505_v44 = vld [vmem:[%s2839_s17 + $0xd0] sm:$0xff]  ;;  %v905_v46 = vor.u32 %v904_v30, %v900_v22 }
  0xbb   : > { %1258 = vrot.lane.b32.xlu0 %v874_v1, %s2731_s18 }
  0xbc   : > { %v1121_v32 = vpop.permute.xlu1 %1120 }
  0xbd   : > { %v1119_v49 = vpop.permute.xlu0 %1118  ;;  %v1380_v37 = vsel %vm1372_vm6, %v1347_v34, %v1121_v32  ;;  %v909_v32 = vrot.slane %v907_v33, 1 }
  0xbe   : > { %1070 = vrot.lane.b32.xlu1 %v874_v1, %s2728_s8  ;;  %v895_v1 = vshll.u32 %v731_v52, 16  ;;  %v1378_v25 = vsel %vm1372_vm6, %v1345_v23, %v1119_v49  ;;  %v604_v49 = vrot.slane %v505_v44, 7 }
  0xbf   : > { %1290 = vrot.lane.b32.xlu0 %v3109_v8, %s2732_s19 }
  0xc0   : > { %v1153_v55 = vpop.permute.xlu1 %1152  ;;  %v897_v5 = vrot.slane %v895_v1, 1  ;;  %v606_v58 = vsel %vm561_vm0, %v604_v49, %v605_v50  ;;  %v684_v59 = vsel %vm561_vm0, 0.0, %v604_v49  ;;  %v1007_v1 = vrot.slane %v3167_v6, 1 }
  0xc1   : > { %v1151_v60 = vpop.permute.xlu0 %1150  ;;  %v1413_v31 = vsel %vm1405_vm7, %v1380_v37, %v1153_v55  ;;  %v910_v55 = vsel %vm742_vm2, %v905_v46, %v909_v32  ;;  %v3226_v62 = vpack.c.bf16 %v606_v58, %v684_v59 }
  0xc2   : > { %1072 = vrot.lane.b32.xlu1 %v886_v27, %s2728_s8  ;;  %v1411_v19 = vsel %vm1405_vm7, %v1378_v25, %v1151_v60 }
  0xc3   : > { %1292 = vrot.lane.b32.xlu0 %v1003_v56, %s2732_s19  ;;  %v1010_v34 = vrot.slane %v3226_v62, 1 }
  0xc4   : > { %v1185_v2 = vpop.permute.xlu1 %1184 }
  0xc5   : > { %v1183_v41 = vpop.permute.xlu0 %1182  ;;  %v1446_v38 = vsel %vm1438_vm8, %v1413_v31, %v1185_v2  ;;  %v1008_v2 = vrot.slane %v3179_v15, 1  ;;  %v912_v15 = vshrl.u32 %v3226_v62, 16 }
  0xc6   : > { %1104 = vrot.lane.b32.xlu1 %v1003_v56, %s2726_s22  ;;  %v1444_v29 = vsel %vm1438_vm8, %v1411_v19, %v1183_v41  ;;  %v507_v41 = vld [vmem:[%s2839_s17 + $0xe0] sm:$0xff] }
  0xc7   : > { %1102 = vrot.lane.b32.xlu0 %v3109_v8, %s2726_s22  ;;  %v898_v8 = vsel %vm742_vm2, %v893_v4, %v897_v5  ;;  %v508_v4 = vld [vmem:[%s2839_s17 + $0xe8] sm:$0xff]  ;;  %v735_v5 = vpack.c.bf16 %v702_v20, %v702_v20  ;;  %v607_v11 = vrot.slane %v507_v41, 7 }
  0xc8   : > { %v1217_v7 = vpop.permute.xlu1 %1216  ;;  %v608_v12 = vrot.slane %v508_v4, 7 }
  0xc9   : > { %v1215_v10 = vpop.permute.xlu0 %1214  ;;  %v1479_v47 = vsel %vm1471_vm9, %v1446_v38, %v1217_v7  ;;  %v914_v7 = vshll.u32 %v3226_v62, 16  ;;  %v685_v25 = vsel %vm561_vm0, 0.0, %v607_v11 }
  0xca   : > { %1136 = vrot.lane.b32.xlu1 %v3147_v45, %s2725_s21  ;;  %v1477_v35 = vsel %vm1471_vm9, %v1444_v29, %v1215_v10  ;;  %v1009_v10 = vsel %vm967_vm1, %v1007_v1, %v1008_v2  ;;  %v703_v30 = vsel %vm561_vm0, %v608_v12, 0.0 }
  0xcb   : > { %1134 = vrot.lane.b32.xlu0 %v3086_v53, %s2725_s21  ;;  %v916_v17 = vrot.slane %v914_v7, 1 }
  0xcc   : > { %v1249_v24 = vpop.permute.xlu1 %1248 }
  0xcd   : > { %v1247_v13 = vpop.permute.xlu0 %1246  ;;  %v1512_v51 = vsel %vm1504_vm10, %v1479_v47, %v1249_v24  ;;  %v609_v24 = vsel %vm561_vm0, %v607_v11, %v608_v12  ;;  %v917_v19 = vor.u32 %v916_v17, %v912_v15  ;;  %v511_v15 = vld [vmem:[%s466_s13] sm:$0xff]  ;;  %v512_v17 = vld [vmem:[%s466_s13 + $0x8] sm:$0xff] }
  0xce   : > { %1168 = vrot.lane.b32.xlu1 %v898_v8, %s2729_s15  ;;  %v1510_v39 = vsel %vm1504_vm10, %v1477_v35, %v1247_v13  ;;  %v3246_v28 = vpack.c.bf16 %v609_v24, %v685_v25  ;;  %v1011_v35 = vrot.slane %v735_v5, 1 }
  0xcf   : > { %1166 = vrot.lane.b32.xlu0 %v886_v27, %s2729_s15 }
  0xd0   : > { %v3198_v36 = vpop.permute.xlu1 %1058 }
  0xd1   : > { %v1279_v42 = vpop.permute.xlu0 %1278  ;;  %v1316_v37 = vsel %vm1306_vm4, %v2920_v21, %v3198_v36  ;;  %v3266_v21 = vsel %vm967_vm1, %v1010_v34, %v1011_v35  ;;  %v924_v36 = vshrl.u32 %v3246_v28, 16 }
  0xd2   : > { %v1543_v27 = vsel %vm1537_vm11, %v1510_v39, %v1279_v42  ;;  %1200 = vrot.lane.b32.xlu1 %v3187_v16, %s2727_s23  ;;  %v3258_v39 = vpack.c.bf16 %v703_v30, %v703_v30  ;;  %v926_v42 = vshll.u32 %v3246_v28, 16 }
  0xd3   : > { %1198 = vrot.lane.b32.xlu0 %v1003_v56, %s2727_s23  ;;  %2505 = vmatprep.mubr.msk.bf16.mxu0 %vm1590_vm12, %v1543_v27 }
  0xd4   : > { %v3212_v48 = vpop.permute.xlu1 %1060  ;;  %v928_v47 = vrot.slane %v926_v42, 1  ;;  %v931_v49 = vshll.u32 %v3258_v39, 16  ;;  %v1014_v25 = vrot.slane %v3258_v39, 1 }
  0xd5   : > { %v1281_v52 = vpop.permute.xlu0 %1280  ;;  %v1318_v46 = vsel %vm1306_vm4, %v2939_v40, %v3212_v48  ;;  %v509_v40 = vld [vmem:[%s2839_s17 + $0xf0] sm:$0xff]  ;;  %v510_v48 = vld [vmem:[%s2839_s17 + $0xf8] sm:$0xff]  ;;  %s2617_s17 = sshll.u32 %s2733_s29, 4  ;;  %s2618_s17 = int_to_ptr.vmem [resolvable:$false] %s2617_s17 }
  0xd6   : > { %v1545_v54 = vsel %vm1537_vm11, %v1512_v51, %v1281_v52  ;;  %1232 = vrot.lane.b32.xlu1 %v3167_v6, %s2730_s16  ;;  %v929_v1 = vor.u32 %v928_v47, %v924_v36  ;;  %v611_v41 = vrot.slane %v510_v48, 7  ;;  %s2619_s10 = scalar_lea.vmem %s2618_s17, 4096 }
  0xd7   : > { %1230 = vrot.lane.b32.xlu0 %v3147_v45, %s2730_s16  ;;  %2506 = vmatmul.mubr.msk.bf16.gmra.mrb[4].mxu0 %vm1590_vm12, %v1545_v54 }
  0xd8   : > { %v1093_v56 = vpop.permute.xlu1 %1092 }
  0xd9   : > { %v1091_v60 = vpop.permute.xlu0 %1090  ;;  %v1351_v50 = vsel %vm1339_vm5, %v1318_v46, %v1093_v56 }
  0xda   : > { %1264 = vrot.lane.b32.xlu1 %v910_v55, %s2731_s18  ;;  %v1349_v44 = vsel %vm1339_vm5, %v1316_v37, %v1091_v60 }
  0xdb   : > { %1262 = vrot.lane.b32.xlu0 %v898_v8, %s2731_s18 }
  0xdc   : > { %v1125_v0 = vpop.permute.xlu1 %1124 }
  0xdd   : > { %v1123_v3 = vpop.permute.xlu0 %1122  ;;  %v1384_v54 = vsel %vm1372_vm6, %v1351_v50, %v1125_v0  ;;  %v933_v0 = vrot.slane %v931_v49, 1 }
  0xde   : > { %1074 = vrot.lane.b32.xlu1 %v898_v8, %s2728_s8  ;;  %v919_v8 = vshll.u32 %v735_v5, 16  ;;  %v1382_v31 = vsel %vm1372_vm6, %v1349_v44, %v1123_v3  ;;  %v610_v3 = vrot.slane %v509_v40, 7 }
  0xdf   : > { %1294 = vrot.lane.b32.xlu0 %v3187_v16, %s2732_s19 }
  0xe0   : > { %v1157_v9 = vpop.permute.xlu1 %1156  ;;  %v921_v22 = vrot.slane %v919_v8, 1  ;;  %v612_v11 = vsel %vm561_vm0, %v610_v3, %v611_v41  ;;  %v686_v12 = vsel %vm561_vm0, 0.0, %v610_v3  ;;  %v1013_v8 = vrot.slane %v3246_v28, 1 }
  0xe1   : > { %v1155_v14 = vpop.permute.xlu0 %1154  ;;  %v1417_v60 = vsel %vm1405_vm7, %v1384_v54, %v1157_v9  ;;  %v934_v9 = vsel %vm742_vm2, %v929_v1, %v933_v0 }
  0xe2   : > { %1076 = vrot.lane.b32.xlu1 %v910_v55, %s2728_s8  ;;  %v1415_v38 = vsel %vm1405_vm7, %v1382_v31, %v1155_v14  ;;  %v1015_v35 = vsel %vm967_vm1, %v1013_v8, %v1014_v25 }
  0xe3   : > { %1296 = vrot.lane.b32.xlu0 %v1009_v10, %s2732_s19 }
  0xe4   : > { %v1189_v23 = vpop.permute.xlu1 %1188 }
  0xe5   : > { %v1187_v13 = vpop.permute.xlu0 %1186  ;;  %v1450_v56 = vsel %vm1438_vm8, %v1417_v60, %v1189_v23  ;;  %v3312_v23 = vpack.c.bf16 %v612_v11, %v686_v12 }
  0xe6   : > { %1108 = vrot.lane.b32.xlu1 %v1009_v10, %s2726_s22  ;;  %v1448_v32 = vsel %vm1438_vm8, %v1415_v38, %v1187_v13  ;;  %v704_v13 = vsel %vm561_vm0, %v611_v41, 0.0 }
  0xe7   : > { %1106 = vrot.lane.b32.xlu0 %v3187_v16, %s2726_s22  ;;  %v922_v16 = vsel %vm742_vm2, %v917_v19, %v921_v22  ;;  %v523_v19 = vmul.f32 0.0, %v511_v15  ;;  %v524_v22 = vmul.f32 0.0, %v512_v17  ;;  %v739_v30 = vpack.c.bf16 %v704_v13, %v704_v13 }
  0xe8   : > { %v1221_v29 = vpop.permute.xlu1 %1220  ;;  %v1017_v39 = vshrl.u32 %v3312_v23, 16  ;;  %v1030_v54 = vrot.slane %v3312_v23, 1 }
  0xe9   : > { %v1219_v33 = vpop.permute.xlu0 %1218  ;;  %v1483_v2 = vsel %vm1471_vm9, %v1450_v56, %v1221_v29  ;;  %v613_v37 = vrot.slane %v523_v19, 7  ;;  %v614_v42 = vrot.slane %v524_v22, 7 }
  0xea   : > { %1140 = vrot.lane.b32.xlu1 %v3226_v62, %s2725_s21  ;;  %v1481_v51 = vsel %vm1471_vm9, %v1448_v32, %v1219_v33  ;;  %v1019_v33 = vshll.u32 %v3312_v23, 16 }
  0xeb   : > { %1138 = vrot.lane.b32.xlu0 %v3167_v6, %s2725_s21  ;;  %v687_v38 = vsel %vm561_vm0, 0.0, %v613_v37  ;;  %v705_v50 = vsel %vm561_vm0, %v614_v42, 0.0 }
  0xec   : > { %v1253_v57 = vpop.permute.xlu1 %1252  ;;  %v741_v40 = vpack.c.bf16 %v705_v50, %v705_v50 }
  0xed   : > { %v1251_v27 = vpop.permute.xlu0 %1250  ;;  %v1516_v4 = vsel %vm1504_vm10, %v1483_v2, %v1253_v57  ;;  %v1021_v57 = vrot.slane %v1019_v33, 1 }
  0xee   : > { %1172 = vrot.lane.b32.xlu1 %v922_v16, %s2729_s15  ;;  %v1514_v58 = vsel %vm1504_vm10, %v1481_v51, %v1251_v27  ;;  %v615_v27 = vsel %vm561_vm0, %v613_v37, %v614_v42 }
  0xef   : > { %1170 = vrot.lane.b32.xlu0 %v910_v55, %s2729_s15  ;;  %v1022_v46 = vor.u32 %v1021_v57, %v1017_v39  ;;  %v740_v47 = vpack.c.bf16 %v615_v27, %v687_v38 }
  0xf0   : > { %v3277_v52 = vpop.permute.xlu1 %1062 }
  0xf1   : > { %v1283_v59 = vpop.permute.xlu0 %1282  ;;  %v1036_v48 = vshll.u32 %v740_v47, 16 }
  0xf2   : > { %v1547_v55 = vsel %vm1537_vm11, %v1514_v58, %v1283_v59  ;;  %1204 = vrot.lane.b32.xlu1 %v3266_v21, %s2727_s23  ;;  %v1031_v58 = vrot.slane %v739_v30, 1  ;;  %v1320_v59 = vsel %vm1306_vm4, %v2969_v63, %v3277_v52  ;;  %v1034_v63 = vshrl.u32 %v740_v47, 16 }
  0xf3   : > { %1202 = vrot.lane.b32.xlu0 %v1009_v10, %s2727_s23  ;;  %2509 = vmatprep.mubr.msk.bf16.mxu0 %vm1590_vm12, %v1547_v55  ;;  %v1038_v41 = vrot.slane %v1036_v48, 1 }
  0xf4   : > { %v3292_v20 = vpop.permute.xlu1 %1064  ;;  %v1032_v2 = vsel %vm967_vm1, %v1030_v54, %v1031_v58 }
  0xf5   : > { %v1285_v5 = vpop.permute.xlu0 %1284  ;;  %v1322_v52 = vsel %vm1306_vm4, %v2986_v18, %v3292_v20 }
  0xf6   : > { %v1549_v7 = vsel %vm1537_vm11, %v1516_v4, %v1285_v5  ;;  %1236 = vrot.lane.b32.xlu1 %v3246_v28, %s2730_s16  ;;  %v1041_v4 = vshll.u32 %v741_v40, 16 }
  0xf7   : > { %1234 = vrot.lane.b32.xlu0 %v3226_v62, %s2730_s16  ;;  %2510 = vmatmul.mubr.msk.bf16.gmra.mrb[8].mxu0 %vm1590_vm12, %v1549_v7 }
  0xf8   : > { %v3305_v10 = vpop.permute.xlu1 %1096 }
  0xf9   : > { %v1095_v14 = vpop.permute.xlu0 %1094  ;;  %v1355_v5 = vsel %vm1339_vm5, %v1322_v52, %v3305_v10  ;;  %v1043_v10 = vrot.slane %v1041_v4, 1 }
  0xfa   : > { %1268 = vrot.lane.b32.xlu1 %v934_v9, %s2731_s18  ;;  %v1353_v60 = vsel %vm1339_vm5, %v1320_v59, %v1095_v14 }
  0xfb   : > { %1266 = vrot.lane.b32.xlu0 %v922_v16, %s2731_s18 }
  0xfc   : > { %v1129_v24 = vpop.permute.xlu1 %1128 }
  0xfd   : > { %v1127_v29 = vpop.permute.xlu0 %1126  ;;  %v1388_v12 = vsel %vm1372_vm6, %v1355_v5, %v1129_v24 }
  0xfe   : > { %1078 = vrot.lane.b32.xlu1 %v922_v16, %s2728_s8  ;;  %v1024_v16 = vshll.u32 %v739_v30, 16  ;;  %v1386_v56 = vsel %vm1372_vm6, %v1353_v60, %v1127_v29  ;;  %v1047_v29 = vrot.slane %v740_v47, 1  ;;  %v1048_v30 = vrot.slane %v741_v40, 1 }
  0xff   : > { %1298 = vrot.lane.b32.xlu0 %v3266_v21, %s2732_s19 }
 0x100   : > { %v1161_v34 = vpop.permute.xlu1 %1160  ;;  %v1026_v32 = vrot.slane %v1024_v16, 1 }
 0x101   : > { %v1159_v44 = vpop.permute.xlu0 %1158  ;;  %v1421_v17 = vsel %vm1405_vm7, %v1388_v12, %v1161_v34 }
 0x102   : > { %1080 = vrot.lane.b32.xlu1 %v934_v9, %s2728_s8  ;;  %v1419_v0 = vsel %vm1405_vm7, %v1386_v56, %v1159_v44 }
 0x103   : > { %1300 = vrot.lane.b32.xlu0 %v1015_v35, %s2732_s19 }
 0x104   : > { %v1193_v31 = vpop.permute.xlu1 %1192 }
 0x105   : > { %v1191_v36 = vpop.permute.xlu0 %1190  ;;  %v1454_v20 = vsel %vm1438_vm8, %v1421_v17, %v1193_v31 }
 0x106   : > { %1112 = vrot.lane.b32.xlu1 %v1015_v35, %s2726_s22  ;;  %v1452_v3 = vsel %vm1438_vm8, %v1419_v0, %v1191_v36 }
 0x107   : > { %1110 = vrot.lane.b32.xlu0 %v3266_v21, %s2726_s22  ;;  %v1027_v21 = vsel %vm742_vm2, %v1022_v46, %v1026_v32 }
 0x108   : > { %v1225_v49 = vpop.permute.xlu1 %1224 }
 0x109   : > { %v1223_v51 = vpop.permute.xlu0 %1222  ;;  %v1487_v8 = vsel %vm1471_vm9, %v1454_v20, %v1225_v49 }
 0x10a   : > { %1144 = vrot.lane.b32.xlu1 %v3312_v23, %s2725_s21  ;;  %v1485_v7 = vsel %vm1471_vm9, %v1452_v3, %v1223_v51 }
 0x10b   : > { %1142 = vrot.lane.b32.xlu0 %v3246_v28, %s2725_s21  ;;  %s2277_s21 = sshll.u32 %s3434_s14, 7 }
 0x10c   : > { %v1257_v55 = vpop.permute.xlu1 %1256  ;;  %s3451_s22 = scalar_lea.vmem [#allocation2], %s2277_s21 }
 0x10d   : > { %v1255_v1 = vpop.permute.xlu0 %1254  ;;  %v1520_v25 = vsel %vm1504_vm10, %v1487_v8, %v1257_v55 }
 0x10e   : > { %1176 = vrot.lane.b32.xlu1 %v1027_v21, %s2729_s15  ;;  %v1518_v14 = vsel %vm1504_vm10, %v1485_v7, %v1255_v1 }
 0x10f   : > { %1174 = vrot.lane.b32.xlu0 %v934_v9, %s2729_s15  ;;  %v1039_v9 = vor.u32 %v1038_v41, %v1034_v63  ;;  %s2079_s15 = sshll.u32 %s3451_s22, 4  ;;  %s3480_s15 = int_to_ptr.vmem [resolvable:$true] %s2079_s15 }
 0x110   : > { %v1067_v11 = vpop.permute.xlu1 %1066  ;;  %s2613_s28 = scalar_lea.vmem %s3480_s15, 2048  ;;  %p2620_p1 = scmp.lt.s32.totalorder %s3480_s15, %s2618_s17 }
 0x111   : > { %v1287_v15 = vpop.permute.xlu0 %1286  ;;  %v1044_v22 = vsel %vm742_vm2, %v1039_v9, %v1043_v10  ;;  %v1324_v27 = vsel %vm1306_vm4, %v3013_v43, %v1067_v11  ;;  %p2614_p12 = scmp.ne.s32.totalorder %s3480_s15, %s2613_s28  ;;  %p2621_p2 = scmp.lt.s32.totalorder %s2619_s10, %s2613_s28 }
 0x112   : > { %v1551_v18 = vsel %vm1537_vm11, %v1518_v14, %v1287_v15  ;;  %1208 = vrot.lane.b32.xlu1 %v1032_v2, %s2727_s23 }
 0x113   : > { %1206 = vrot.lane.b32.xlu0 %v1015_v35, %s2727_s23  ;;  %2513 = vmatprep.mubr.msk.bf16.mxu0 %vm1590_vm12, %v1551_v18  ;;  %v1049_v35 = vsel %vm967_vm1, %v1047_v29, %v1048_v30  ;;  %s2379_s23 = sshll.u32 %s2715_s4, 11  ;;  %p2615_p13 = pnand %p2614_p12, %p2816_p4 }
 0x114   : > { %v1069_v24 = vpop.permute.xlu1 %1068  ;;  %p2622_p3 = por %p2621_p2, %p2620_p1 }
 0x115   : > { %v1289_v13 = vpop.permute.xlu0 %1288  ;;  %v1326_v49 = vsel %vm1306_vm4, %v3030_v61, %v1069_v24  ;;  %p2616_p0 = pneg %p2615_p13 }
 0x116   : > { %v1553_v19 = vsel %vm1537_vm11, %v1520_v25, %v1289_v13  ;;  %1240 = vrot.lane.b32.xlu1 %v740_v47, %s2730_s16 }
 0x117   : > { %1238 = vrot.lane.b32.xlu0 %v3312_v23, %s2730_s16  ;;  %2514 = vmatmul.mubr.msk.bf16.gmra.mrb[12].mxu0 %vm1590_vm12, %v1553_v19  ;;  %p2623_p5 = pnand %p2622_p3, %p2616_p0 }
 0x118   : > { %v1101_v33 = vpop.permute.xlu1 %1100 }
 0x119   : > { %v1099_v34 = vpop.permute.xlu0 %1098  ;;  %v1359_v51 = vsel %vm1339_vm5, %v1326_v49, %v1101_v33 }
 0x11a   : > { %1272 = vrot.lane.b32.xlu1 %v1044_v22, %s2731_s18  ;;  %v1357_v38 = vsel %vm1339_vm5, %v1324_v27, %v1099_v34 }
 0x11b   : > { %1270 = vrot.lane.b32.xlu0 %v1027_v21, %s2731_s18 }
 0x11c   : > { %v1133_v37 = vpop.permute.xlu1 %1132 }
 0x11d   : > { %v1131_v42 = vpop.permute.xlu0 %1130  ;;  %v1392_v43 = vsel %vm1372_vm6, %v1359_v51, %v1133_v37 }
 0x11e   : > { %1304 = vrot.lane.b32.xlu1 %v1049_v35, %s2732_s19  ;;  %v1390_v46 = vsel %vm1372_vm6, %v1357_v38, %v1131_v42 }
 0x11f   : > { %1302 = vrot.lane.b32.xlu0 %v1032_v2, %s2732_s19  ;;  %s3478_s19 = scalar_lea.hbm %s3569_s6, %s2379_s23 }
 0x120   : > { %v1165_v23 = vpop.permute.xlu1 %1164 }
 0x121   : > { %v1163_v44 = vpop.permute.xlu0 %1162  ;;  %v1425_v40 = vsel %vm1405_vm7, %v1392_v43, %v1165_v23 }
 0x122   : > { %v1423_v47 = vsel %vm1405_vm7, %v1390_v46, %v1163_v44 }
 0x124   : > { %v1197_v39 = vpop.permute.xlu1 %1196 }
 0x125   : > { %v1195_v57 = vpop.permute.xlu0 %1194  ;;  %v1458_v60 = vsel %vm1438_vm8, %v1425_v40, %v1197_v39 }
 0x126   : > { %v1456_v50 = vsel %vm1438_vm8, %v1423_v47, %v1195_v57 }
 0x128   : > { %v1229_v16 = vpop.permute.xlu1 %1228 }
 0x129   : > { %v1227_v31 = vpop.permute.xlu0 %1226  ;;  %v1491_v61 = vsel %vm1471_vm9, %v1458_v60, %v1229_v16 }
 0x12a   : > { %v1489_v54 = vsel %vm1471_vm9, %v1456_v50, %v1227_v31 }
 0x12c   : > { %v1261_v36 = vpop.permute.xlu1 %1260 }
 0x12d   : > { %v1259_v32 = vpop.permute.xlu0 %1258  ;;  %v1524_v56 = vsel %vm1504_vm10, %v1491_v61, %v1261_v36 }
 0x12e   : > { %v1522_v59 = vsel %vm1504_vm10, %v1489_v54, %v1259_v32 }
 0x130   : > { %v1071_v58 = vpop.permute.xlu1 %1070 }
 0x131   : > { %v1291_v21 = vpop.permute.xlu0 %1290  ;;  %v1328_v14 = vsel %vm1306_vm4, %v3062_v26, %v1071_v58 }
 0x132   : > { %v1555_v48 = vsel %vm1537_vm11, %v1522_v59, %v1291_v21 }
 0x133   : > { %2517 = vmatprep.mubr.msk.bf16.mxu1 %vm1590_vm12, %v1555_v48 }
 0x134   : > { %v1073_v55 = vpop.permute.xlu1 %1072 }
 0x135   : > { %v1293_v1 = vpop.permute.xlu0 %1292  ;;  %v1330_v10 = vsel %vm1306_vm4, %v3086_v53, %v1073_v55 }
 0x136   : > { %v1557_v0 = vsel %vm1537_vm11, %v1524_v56, %v1293_v1 }
 0x137   : > { %2518 = vmatmul.mubr.msk.bf16.vlgmr.msra.gmra.mrb[0].mxu1 %vm1590_vm12, %v1557_v0 }
 0x138   : > { %v1105_v2 = vpop.permute.xlu1 %1104 }
 0x139   : > { %v1103_v63 = vpop.permute.xlu0 %1102  ;;  %v1363_v24 = vsel %vm1339_vm5, %v1330_v10, %v1105_v2 }
 0x13a   : > { %v1361_v15 = vsel %vm1339_vm5, %v1328_v14, %v1103_v63 }
 0x13c   : > { %v1137_v52 = vpop.permute.xlu1 %1136 }
 0x13d   : > { %v1135_v3 = vpop.permute.xlu0 %1134  ;;  %v1396_v26 = vsel %vm1372_vm6, %v1363_v24, %v1137_v52 }
 0x13e   : > { %v1394_v18 = vsel %vm1372_vm6, %v1361_v15, %v1135_v3 }
 0x140   : > { %v1169_v41 = vpop.permute.xlu1 %1168 }
 0x141   : > { %v1167_v4 = vpop.permute.xlu0 %1166  ;;  %v1429_v29 = vsel %vm1405_vm7, %v1396_v26, %v1169_v41 }
 0x142   : > { %v1427_v9 = vsel %vm1405_vm7, %v1394_v18, %v1167_v4 }
 0x144   : > { %v1201_v5 = vpop.permute.xlu1 %1200 }
 0x145   : > { %v1199_v7 = vpop.permute.xlu0 %1198  ;;  %v1462_v33 = vsel %vm1438_vm8, %v1429_v29, %v1201_v5 }
 0x146   : > { %v1460_v8 = vsel %vm1438_vm8, %v1427_v9, %v1199_v7 }
 0x148   : > { %v1233_v11 = vpop.permute.xlu1 %1232 }
 0x149   : > { %v1231_v12 = vpop.permute.xlu0 %1230  ;;  %v1495_v53 = vsel %vm1471_vm9, %v1462_v33, %v1233_v11 }
 0x14a   : > { %v1493_v25 = vsel %vm1471_vm9, %v1460_v8, %v1231_v12 }
 0x14c   : > { %v1265_v17 = vpop.permute.xlu1 %1264 }
 0x14d   : > { %v1263_v20 = vpop.permute.xlu0 %1262  ;;  %v1528_v35 = vsel %vm1504_vm10, %v1495_v53, %v1265_v17 }
 0x14e   : > { %v1526_v19 = vsel %vm1504_vm10, %v1493_v25, %v1263_v20 }
 0x150   : > { %v1075_v13 = vpop.permute.xlu1 %1074 }
 0x151   : > { %v1295_v22 = vpop.permute.xlu0 %1294  ;;  %v1332_v32 = vsel %vm1306_vm4, %v3147_v45, %v1075_v13 }
 0x152   : > { %v1559_v30 = vsel %vm1537_vm11, %v1526_v19, %v1295_v22 }
 0x153   : > { %2521 = vmatprep.mubr.msk.bf16.mxu1 %vm1590_vm12, %v1559_v30 }
 0x154   : > { %v1077_v34 = vpop.permute.xlu1 %1076 }
 0x155   : > { %v1297_v37 = vpop.permute.xlu0 %1296  ;;  %v1334_v58 = vsel %vm1306_vm4, %v3167_v6, %v1077_v34 }
 0x156   : > { %v1561_v42 = vsel %vm1537_vm11, %v1528_v35, %v1297_v37 }
 0x157   : > { %2522 = vmatmul.mubr.msk.bf16.gmra.mrb[4].mxu1 %vm1590_vm12, %v1561_v42 }
 0x158   : > { %v1109_v23 = vpop.permute.xlu1 %1108 }
 0x159   : > { %v1107_v44 = vpop.permute.xlu0 %1106  ;;  %v1367_v59 = vsel %vm1339_vm5, %v1334_v58, %v1109_v23 }
 0x15a   : > { %v1365_v47 = vsel %vm1339_vm5, %v1332_v32, %v1107_v44 }
 0x15c   : > { %v1141_v39 = vpop.permute.xlu1 %1140 }
 0x15d   : > { %v1139_v57 = vpop.permute.xlu0 %1138  ;;  %v1400_v45 = vsel %vm1372_vm6, %v1367_v59, %v1141_v39 }
 0x15e   : > { %v1398_v50 = vsel %vm1372_vm6, %v1365_v47, %v1139_v57 }
 0x160   : > { %v1173_v16 = vpop.permute.xlu1 %1172 }
 0x161   : > { %v1171_v31 = vpop.permute.xlu0 %1170  ;;  %v1433_v61 = vsel %vm1405_vm7, %v1400_v45, %v1173_v16 }
 0x162   : > { %v1431_v54 = vsel %vm1405_vm7, %v1398_v50, %v1171_v31 }
 0x164   : > { %v1205_v27 = vpop.permute.xlu1 %1204 }
 0x165   : > { %v1203_v38 = vpop.permute.xlu0 %1202  ;;  %v1466_v56 = vsel %vm1438_vm8, %v1433_v61, %v1205_v27 }
 0x166   : > { %v1464_v43 = vsel %vm1438_vm8, %v1431_v54, %v1203_v38 }
 0x168   : > { %v1237_v36 = vpop.permute.xlu1 %1236 }
 0x169   : > { %v1235_v46 = vpop.permute.xlu0 %1234  ;;  %v1499_v6 = vsel %vm1471_vm9, %v1466_v56, %v1237_v36 }
 0x16a   : > { %v1497_v21 = vsel %vm1471_vm9, %v1464_v43, %v1235_v46 }
 0x16c   : > { %v1269_v49 = vpop.permute.xlu1 %1268 }
 0x16d   : > { %v1267_v51 = vpop.permute.xlu0 %1266  ;;  %v1532_v0 = vsel %vm1504_vm10, %v1499_v6, %v1269_v49 }
 0x16e   : > { %v1530_v48 = vsel %vm1504_vm10, %v1497_v21, %v1267_v51 }
 0x170   : > { %v1079_v40 = vpop.permute.xlu1 %1078 }
 0x171   : > { %v1299_v60 = vpop.permute.xlu0 %1298  ;;  %v1336_v15 = vsel %vm1306_vm4, %v3226_v62, %v1079_v40 }
 0x172   : > { %v1563_v55 = vsel %vm1537_vm11, %v1530_v48, %v1299_v60 }
 0x173   : > { %2525 = vmatprep.mubr.msk.bf16.mxu1 %vm1590_vm12, %v1563_v55 }
 0x174   : > { %v1081_v1 = vpop.permute.xlu1 %1080 }
 0x175   : > { %v1301_v2 = vpop.permute.xlu0 %1300  ;;  %v1338_v17 = vsel %vm1306_vm4, %v3246_v28, %v1081_v1 }
 0x176   : > { %v1565_v63 = vsel %vm1537_vm11, %v1532_v0, %v1301_v2 }
 0x177   : > { %2526 = vmatmul.mubr.msk.bf16.gmra.mrb[8].mxu1 %vm1590_vm12, %v1565_v63 }
 0x178   : > { %v1113_v52 = vpop.permute.xlu1 %1112 }
 0x179   : > { %v1111_v3 = vpop.permute.xlu0 %1110  ;;  %v1371_v20 = vsel %vm1339_vm5, %v1338_v17, %v1113_v52 }
 0x17a   : > { %v1369_v9 = vsel %vm1339_vm5, %v1336_v15, %v1111_v3 }
 0x17c   : > { %v1145_v41 = vpop.permute.xlu1 %1144 }
 0x17d   : > { %v1143_v4 = vpop.permute.xlu0 %1142  ;;  %v1404_v8 = vsel %vm1372_vm6, %v1371_v20, %v1145_v41 }
 0x17e   : > { %v1402_v24 = vsel %vm1372_vm6, %v1369_v9, %v1143_v4 }
 0x180   : > { %v1177_v5 = vpop.permute.xlu1 %1176 }
 0x181   : > { %v1175_v7 = vpop.permute.xlu0 %1174  ;;  %v1437_v13 = vsel %vm1405_vm7, %v1404_v8, %v1177_v5 }
 0x182   : > { %v1435_v26 = vsel %vm1405_vm7, %v1402_v24, %v1175_v7 }
 0x184   : > { %v1209_v11 = vpop.permute.xlu1 %1208 }
 0x185   : > { %v1207_v12 = vpop.permute.xlu0 %1206  ;;  %v1470_v28 = vsel %vm1438_vm8, %v1437_v13, %v1209_v11 }
 0x186   : > { %v1468_v22 = vsel %vm1438_vm8, %v1435_v26, %v1207_v12 }
 0x188   : > { %v1241_v14 = vpop.permute.xlu1 %1240 }
 0x189   : > { %v1239_v18 = vpop.permute.xlu0 %1238  ;;  %v1503_v42 = vsel %vm1471_vm9, %v1470_v28, %v1241_v14 }
 0x18a   : > { %v2503_v10 = vpop.f32.mrb[0].mxu0  ;;  %v1501_v23 = vsel %vm1471_vm9, %v1468_v22, %v1239_v18 }
 0x18b   : > { %v1661_v25 = vpop.f32.mrb[1].mxu0  ;;  %v1827_v44 = vmul.f32 %v2503_v10, %v2503_v10 }
 0x18c   : > { %v2504_v62 = vpop.f32.mrb[2].mxu0  ;;  %v1273_v19 = vpop.permute.xlu1 %1272  ;;  %v1825_v53 = vmul.f32 %v1661_v25, %v1661_v25 }
 0x18d   : > { %v2388_v29 = vpack.c.bf16 %v2504_v62, %v2503_v10  ;;  %v1664_v30 = vpop.f32.mrb[3].mxu0  ;;  %v1271_v33 = vpop.permute.xlu0 %1270  ;;  %v1536_v39 = vsel %vm1504_vm10, %v1503_v42, %v1273_v19  ;;  %v1828_v46 = vmul.f32 %v2504_v62, %v2504_v62 }
 0x18e   : > { %v1788_v34 = vadd.f32 %v1664_v30, %v1661_v25  ;;  %v1826_v35 = vmul.f32 %v1664_v30, %v1664_v30  ;;  %v2383_v37 = vpack.c.bf16 %v1664_v30, %v1661_v25  ;;  %v1534_v27 = vsel %vm1504_vm10, %v1501_v23, %v1271_v33 }
 0x18f   : > { %2461 = vst [vmem:[%s3451_s22 + $0x8] sm:$0xff] %v2388_v29  }
 0x190   : > { %v1789_v57 = vadd.f32 %v2503_v10, %v1788_v34  ;;  %v1857_v16 = vadd.f32 %v1826_v35, %v1825_v53  ;;  %2384 = vst [vmem:[%s3451_s22] sm:$0xff] %v2383_v37   ;;  %v1305_v31 = vpop.permute.xlu1 %1304 }
 0x191   : > { %v1569_v38 = vsel %vm1537_vm11, %v1536_v39, %v1305_v31  ;;  %v1303_v36 = vpop.permute.xlu0 %1302 }
 0x192   : > { %v1858_v32 = vadd.f32 %v1857_v16, %v1827_v44  ;;  %v1567_v47 = vsel %vm1537_vm11, %v1534_v27, %v1303_v36  ;;  %v1790_v49 = vadd.f32 %v2504_v62, %v1789_v57 }
 0x193   : > { %2529 = vmatprep.mubr.msk.bf16.mxu1 %vm1590_vm12, %v1567_v47 }
 0x194   : > { %2530 = vmatmul.mubr.msk.bf16.gmra.mrb[12].mxu1 %vm1590_vm12, %v1569_v38  ;;  %v1859_v50 = vadd.f32 %v1858_v32, %v1828_v46 }
 0x1aa   : > { %v2507_v51 = vpop.f32.mrb[4].mxu0 }
 0x1ab   : > { %v1677_v54 = vpop.f32.mrb[5].mxu0  ;;  %v1831_v55 = vmul.f32 %v2507_v51, %v2507_v51 }
 0x1ac   : > { %v1791_v58 = vadd.f32 %v1790_v49, %v1677_v54  ;;  %v1829_v43 = vmul.f32 %v1677_v54, %v1677_v54  ;;  %v2508_v59 = vpop.f32.mrb[6].mxu0 }
 0x1ad   : > { %v2398_v21 = vpack.c.bf16 %v2508_v59, %v2507_v51  ;;  %v1680_v40 = vpop.f32.mrb[7].mxu0  ;;  %v1832_v1 = vmul.f32 %v2508_v59, %v2508_v59 }
 0x1ae   : > { %v1860_v45 = vadd.f32 %v1859_v50, %v1829_v43  ;;  %v1792_v48 = vadd.f32 %v1791_v58, %v1680_v40  ;;  %v1830_v60 = vmul.f32 %v1680_v40, %v1680_v40  ;;  %v2393_v61 = vpack.c.bf16 %v1680_v40, %v1677_v54 }
 0x1af   : > { %2463 = vst [vmem:[%s3451_s22 + $0x18] sm:$0xff] %v2398_v21  }
 0x1b0   : > { %v1793_v56 = vadd.f32 %v2507_v51, %v1792_v48  ;;  %v1861_v6 = vadd.f32 %v1860_v45, %v1830_v60  ;;  %2462 = vst [vmem:[%s3451_s22 + $0x10] sm:$0xff] %v2393_v61  }
 0x1b2   : > { %v1862_v0 = vadd.f32 %v1861_v6, %v1831_v55  ;;  %v1794_v2 = vadd.f32 %v2508_v59, %v1793_v56 }
 0x1b4   : > { %v1863_v63 = vadd.f32 %v1862_v0, %v1832_v1 }
 0x1ca   : > { %v2511_v52 = vpop.f32.mrb[8].mxu0 }
 0x1cb   : > { %v1693_v3 = vpop.f32.mrb[9].mxu0  ;;  %v1835_v18 = vmul.f32 %v2511_v52, %v2511_v52 }
 0x1cc   : > { %v1795_v41 = vadd.f32 %v1794_v2, %v1693_v3  ;;  %v1833_v4 = vmul.f32 %v1693_v3, %v1693_v3  ;;  %v2512_v5 = vpop.f32.mrb[10].mxu0 }
 0x1cd   : > { %v2408_v7 = vpack.c.bf16 %v2512_v5, %v2511_v52  ;;  %v1696_v11 = vpop.f32.mrb[11].mxu0  ;;  %v1836_v10 = vmul.f32 %v2512_v5, %v2512_v5 }
 0x1ce   : > { %v1864_v12 = vadd.f32 %v1863_v63, %v1833_v4  ;;  %v1796_v14 = vadd.f32 %v1795_v41, %v1696_v11  ;;  %v1834_v15 = vmul.f32 %v1696_v11, %v1696_v11  ;;  %v2403_v17 = vpack.c.bf16 %v1696_v11, %v1693_v3 }
 0x1cf   : > { %2465 = vst [vmem:[%s3451_s22 + $0x28] sm:$0xff] %v2408_v7  }
 0x1d0   : > { %v1797_v20 = vadd.f32 %v2511_v52, %v1796_v14  ;;  %v1865_v9 = vadd.f32 %v1864_v12, %v1834_v15  ;;  %2464 = vst [vmem:[%s3451_s22 + $0x20] sm:$0xff] %v2403_v17  }
 0x1d2   : > { %v1866_v8 = vadd.f32 %v1865_v9, %v1835_v18  ;;  %v1798_v24 = vadd.f32 %v2512_v5, %v1797_v20 }
 0x1d4   : > { %v1867_v25 = vadd.f32 %v1866_v8, %v1836_v10 }
 0x1ea   : > { %v2515_v13 = vpop.f32.mrb[12].mxu0 }
 0x1eb   : > { %v1709_v26 = vpop.f32.mrb[13].mxu0  ;;  %v1839_v35 = vmul.f32 %v2515_v13, %v2515_v13 }
 0x1ec   : > { %v1799_v62 = vadd.f32 %v1798_v24, %v1709_v26  ;;  %v1837_v19 = vmul.f32 %v1709_v26, %v1709_v26  ;;  %v2516_v28 = vpop.f32.mrb[14].mxu0 }
 0x1ed   : > { %v2418_v22 = vpack.c.bf16 %v2516_v28, %v2515_v13  ;;  %v1712_v29 = vpop.f32.mrb[15].mxu0  ;;  %v1840_v23 = vmul.f32 %v2516_v28, %v2516_v28 }
 0x1ee   : > { %v1868_v30 = vadd.f32 %v1867_v25, %v1837_v19  ;;  %v1800_v33 = vadd.f32 %v1799_v62, %v1712_v29  ;;  %v1838_v53 = vmul.f32 %v1712_v29, %v1712_v29  ;;  %v2413_v34 = vpack.c.bf16 %v1712_v29, %v1709_v26 }
 0x1ef   : > { %2467 = vst [vmem:[%s3451_s22 + $0x38] sm:$0xff] %v2418_v22  }
 0x1f0   : > { %v1801_v37 = vadd.f32 %v2515_v13, %v1800_v33  ;;  %v1869_v42 = vadd.f32 %v1868_v30, %v1838_v53  ;;  %2466 = vst [vmem:[%s3451_s22 + $0x30] sm:$0xff] %v2413_v34  }
 0x1f2   : > { %v1870_v44 = vadd.f32 %v1869_v42, %v1839_v35  ;;  %v1802_v39 = vadd.f32 %v2516_v28, %v1801_v37 }
 0x1f4   : > { %v1871_v57 = vadd.f32 %v1870_v44, %v1840_v23 }
 0x20a   : > { %v2519_v16 = vpop.f32.mrb[0].mxu1 }
 0x20b   : > { %v1725_v31 = vpop.f32.mrb[1].mxu1  ;;  %v1843_v54 = vmul.f32 %v2519_v16, %v2519_v16 }
 0x20c   : > { %v1803_v27 = vadd.f32 %v1802_v39, %v1725_v31  ;;  %v1841_v38 = vmul.f32 %v1725_v31, %v1725_v31  ;;  %v2520_v36 = vpop.f32.mrb[2].mxu1 }
 0x20d   : > { %v2428_v46 = vpack.c.bf16 %v2520_v36, %v2519_v16  ;;  %v1728_v32 = vpop.f32.mrb[3].mxu1  ;;  %v1844_v59 = vmul.f32 %v2520_v36, %v2520_v36 }
 0x20e   : > { %v1872_v47 = vadd.f32 %v1871_v57, %v1841_v38  ;;  %v1804_v49 = vadd.f32 %v1803_v27, %v1728_v32  ;;  %v1842_v50 = vmul.f32 %v1728_v32, %v1728_v32  ;;  %v2423_v51 = vpack.c.bf16 %v1728_v32, %v1725_v31 }
 0x20f   : > { %2469 = vst [vmem:[%s3451_s22 + $0x48] sm:$0xff] %v2428_v46  }
 0x210   : > { %v1805_v58 = vadd.f32 %v2519_v16, %v1804_v49  ;;  %v1873_v43 = vadd.f32 %v1872_v47, %v1842_v50  ;;  %2468 = vst [vmem:[%s3451_s22 + $0x40] sm:$0xff] %v2423_v51  }
 0x212   : > { %v1874_v21 = vadd.f32 %v1873_v43, %v1843_v54  ;;  %v1806_v40 = vadd.f32 %v2520_v36, %v1805_v58 }
 0x214   : > { %v1875_v45 = vadd.f32 %v1874_v21, %v1844_v59 }
 0x22a   : > { %v2523_v48 = vpop.f32.mrb[4].mxu1 }
 0x22b   : > { %v1741_v60 = vpop.f32.mrb[5].mxu1  ;;  %v1847_v3 = vmul.f32 %v2523_v48, %v2523_v48 }
 0x22c   : > { %v1807_v61 = vadd.f32 %v1806_v40, %v1741_v60  ;;  %v1845_v55 = vmul.f32 %v1741_v60, %v1741_v60  ;;  %v2524_v56 = vpop.f32.mrb[6].mxu1 }
 0x22d   : > { %v2438_v6 = vpack.c.bf16 %v2524_v56, %v2523_v48  ;;  %v1744_v1 = vpop.f32.mrb[7].mxu1  ;;  %v1848_v5 = vmul.f32 %v2524_v56, %v2524_v56 }
 0x22e   : > { %v1876_v0 = vadd.f32 %v1875_v45, %v1845_v55  ;;  %v1808_v2 = vadd.f32 %v1807_v61, %v1744_v1  ;;  %v1846_v63 = vmul.f32 %v1744_v1, %v1744_v1  ;;  %v2433_v52 = vpack.c.bf16 %v1744_v1, %v1741_v60 }
 0x22f   : > { %2471 = vst [vmem:[%s3451_s22 + $0x58] sm:$0xff] %v2438_v6  }
 0x230   : > { %v1809_v41 = vadd.f32 %v2523_v48, %v1808_v2  ;;  %v1877_v4 = vadd.f32 %v1876_v0, %v1846_v63  ;;  %2470 = vst [vmem:[%s3451_s22 + $0x50] sm:$0xff] %v2433_v52  }
 0x232   : > { %v1878_v7 = vadd.f32 %v1877_v4, %v1847_v3  ;;  %v1810_v11 = vadd.f32 %v2524_v56, %v1809_v41 }
 0x234   : > { %v1879_v12 = vadd.f32 %v1878_v7, %v1848_v5 }
 0x24a   : > { %v2527_v14 = vpop.f32.mrb[8].mxu1 }
 0x24b   : > { %v1757_v15 = vpop.f32.mrb[9].mxu1  ;;  %v1851_v26 = vmul.f32 %v2527_v14, %v2527_v14 }
 0x24c   : > { %v1811_v17 = vadd.f32 %v1810_v11, %v1757_v15  ;;  %v1849_v18 = vmul.f32 %v1757_v15, %v1757_v15  ;;  %v2528_v20 = vpop.f32.mrb[10].mxu1 }
 0x24d   : > { %v2448_v9 = vpack.c.bf16 %v2528_v20, %v2527_v14  ;;  %v1760_v10 = vpop.f32.mrb[11].mxu1  ;;  %v1852_v28 = vmul.f32 %v2528_v20, %v2528_v20 }
 0x24e   : > { %v1880_v8 = vadd.f32 %v1879_v12, %v1849_v18  ;;  %v1812_v24 = vadd.f32 %v1811_v17, %v1760_v10  ;;  %v1850_v25 = vmul.f32 %v1760_v10, %v1760_v10  ;;  %v2443_v13 = vpack.c.bf16 %v1760_v10, %v1757_v15 }
 0x24f   : > { %2473 = vst [vmem:[%s3451_s22 + $0x68] sm:$0xff] %v2448_v9  }
 0x250   : > { %v1813_v62 = vadd.f32 %v2527_v14, %v1812_v24  ;;  %v1881_v19 = vadd.f32 %v1880_v8, %v1850_v25  ;;  %2472 = vst [vmem:[%s3451_s22 + $0x60] sm:$0xff] %v2443_v13  }
 0x252   : > { %v1882_v22 = vadd.f32 %v1881_v19, %v1851_v26  ;;  %v1814_v29 = vadd.f32 %v2528_v20, %v1813_v62 }
 0x254   : > { %v1883_v30 = vadd.f32 %v1882_v22, %v1852_v28 }
 0x267   : > { %v2531_v33 = vpop.f32.mrb[12].mxu1 }
 0x268   : > { %v1773_v53 = vpop.f32.mrb[13].mxu1  ;;  %v1855_v31 = vmul.f32 %v2531_v33, %v2531_v33 }
 0x269   : > { %v1815_v34 = vadd.f32 %v1814_v29, %v1773_v53  ;;  %v1853_v35 = vmul.f32 %v1773_v53, %v1773_v53  ;;  %v2532_v37 = vpop.f32.mrb[14].mxu1 }
 0x26a   : > { %v2458_v42 = vpack.c.bf16 %v2532_v37, %v2531_v33  ;;  %v1776_v23 = vpop.f32.mrb[15].mxu1 }
 0x26b   : > { %v1884_v44 = vadd.f32 %v1883_v30, %v1853_v35  ;;  %v1816_v39 = vadd.f32 %v1815_v34, %v1776_v23  ;;  %v1854_v57 = vmul.f32 %v1776_v23, %v1776_v23  ;;  %v2453_v16 = vpack.c.bf16 %v1776_v23, %v1773_v53 }
 0x26c   : > { %2475 = vst [vmem:[%s3451_s22 + $0x78] sm:$0xff] %v2458_v42  }
 0x26d   : > { %v1817_v27 = vadd.f32 %v2531_v33, %v1816_v39  ;;  %v1885_v38 = vadd.f32 %v1884_v44, %v1854_v57  ;;  %2474 = vst [vmem:[%s3451_s22 + $0x70] sm:$0xff] %v2453_v16  }
 0x26e   : > { %2626 = shalt.err (!%p2623_p5)
}
 0x26f   : > { %s2627_s13 = scalar_lea.hbm %s3478_s19, 2048  ;;  %s2631_s23 = scalar_lea.hbm %s3569_s6, 4096 }
 0x270   : > { %p2628_p6 = scmp.ne.s32.totalorder %s3478_s19, %s2627_s13  ;;  %p2632_p10 = scmp.lt.u32.totalorder %s3478_s19, %s3569_s6 }
 0x271   : > { %p2633_p11 = scmp.lt.u32.totalorder %s2631_s23, %s2627_s13  ;;  %p2635_p13 = scmp.lt.u32.totalorder %s2627_s13, %s3478_s19 }
 0x272   : > { %p2629_p7 = pnand %p2628_p6, %p2816_p4 }
 0x273   : > { %p2634_p12 = por %p2633_p11, %p2632_p10 }
 0x274   : > { %p2630_p9 = pneg %p2629_p7 }
 0x275   : > { %p2636_p0 = por %p2635_p13, %p2634_p12 }
 0x277   : > { %p2637_p1 = pnand %p2636_p0, %p2630_p9 }
 0x279   : > { %2640 = shalt.err (!%p2637_p1)
}
 0x27a   : > { %s2734_s28 = smov 64   ;;  %v1856_v36 = vmul.f32 %v2532_v37, %v2532_v37  ;;  %v1818_v46 = vadd.f32 %v2532_v37, %v1817_v27  ;;  %v1886_v32 = vadd.f32 %v1885_v38, %v1855_v31  ;;  %s2278_s29 = sshll.u32 %s3434_s14, 1 }
 0x27b   : > { %2541 = dma.vmem_to_hbm [thread:$0]  (%p2816_p4), %s3480_s15, 2048, %s3478_s19, %s2057_s20, %s2734_s28, %s2734_s28, %s2728_s8  }
 0x27c   : > { %v1819_v47 = vrot.slane %v1818_v46, 4  ;;  %v1887_v49 = vadd.f32 %v1886_v32, %v1856_v36  ;;  %s2340_s17 = sshll.u32 %s2715_s4, 5  ;;  %s425_s8 = scalar_lea.vmem [#allocation4], %s2278_s29 }
 0x27d   : > { %s2097_s15 = sshll.u32 %s425_s8, 4  ;;  %s3514_s10 = scalar_lea.hbm %s3570_s7, %s2340_s17  ;;  %s3516_s15 = int_to_ptr.vmem [resolvable:$true] %s2097_s15 }
 0x27e   : > { %v1820_v50 = vadd.f32 %v1819_v47, %v1818_v46  ;;  %v1888_v51 = vrot.slane %v1887_v49, 4  ;;  %s2062_s13 = scalar_lea.sflag [#allocation5], %s3434_s14  ;;  %s2641_s21 = scalar_lea.vmem %s3516_s15, 32 }
 0x27f   : > { %p2642_p2 = scmp.ne.s32.totalorder %s3516_s15, %s2641_s21  ;;  %s2735_s4 = smov [#allocation4]  }
 0x280   : > { %v1821_v54 = vrot.slane %v1820_v50, 2  ;;  %v1889_v58 = vadd.f32 %v1888_v51, %v1887_v49  ;;  %s2645_s22 = sshll.u32 %s2735_s4, 4  ;;  %s2646_s22 = int_to_ptr.vmem [resolvable:$false] %s2645_s22 }
 0x281   : > { %p2643_p3 = pnand %p2642_p2, %p2816_p4  ;;  %s2647_s23 = scalar_lea.vmem %s2646_s22, 64 }
 0x282   : > { %v1822_v43 = vadd.f32 %v1821_v54, %v1820_v50  ;;  %v1890_v59 = vrot.slane %v1889_v58, 2  ;;  %p2648_p6 = scmp.lt.s32.totalorder %s3516_s15, %s2646_s22  ;;  %p2649_p7 = scmp.lt.s32.totalorder %s2647_s23, %s2641_s21 }
 0x283   : > { %p2644_p5 = pneg %p2643_p3 }
 0x284   : > { %v1823_v21 = vrot.slane %v1822_v43, 1  ;;  %v1891_v40 = vadd.f32 %v1890_v59, %v1889_v58  ;;  %p2650_p9 = por %p2649_p7, %p2648_p6 }
 0x286   : > { %v1892_v45 = vrot.slane %v1891_v40, 1  ;;  %v1824_v48 = vadd.f32 %v1823_v21, %v1822_v43  ;;  %p2651_p10 = pnand %p2650_p9, %p2644_p5 }
 0x288   : > { %v1893_v60 = vadd.f32 %v1892_v45, %v1891_v40 }
 0x28a   : > { %v1894_v61 = vsel %vm561_vm0, %v1824_v48, %v1893_v60 }
 0x28b   : > { %1895 = vst [vmem:[%s425_s8] sm:$0x3] %v1894_v61 }
 0x28c   : > { %2654 = shalt.err (!%p2651_p10)
}
 0x28d   : > { %s2655_s14 = scalar_lea.hbm %s3514_s10, 32  ;;  %s2659_s28 = scalar_lea.hbm %s3570_s7, 64 }
 0x28e   : > { %p2656_p11 = scmp.ne.s32.totalorder %s3514_s10, %s2655_s14  ;;  %p2660_p0 = scmp.lt.u32.totalorder %s3514_s10, %s3570_s7 }
 0x28f   : > { %p2661_p1 = scmp.lt.u32.totalorder %s2659_s28, %s2655_s14  ;;  %p2663_p3 = scmp.lt.u32.totalorder %s2655_s14, %s3514_s10 }
 0x290   : > { %p2657_p12 = pnand %p2656_p11, %p2816_p4 }
 0x291   : > { %p2662_p2 = por %p2661_p1, %p2660_p0 }
 0x292   : > { %p2658_p13 = pneg %p2657_p12 }
 0x293   : > { %p2664_p5 = por %p2663_p3, %p2662_p2 }
 0x295   : > { %p2665_p6 = pnand %p2664_p5, %p2658_p13 }
 0x297   : > { %2668 = shalt.err (!%p2665_p6)
}
 0x298   : > { %2542 = dma.vmem_to_hbm [thread:$0]  (%p2816_p4), %s3516_s15, 32, %s3514_s10, %s2062_s13  }
 0x299 PF: > { %p2552_p7 = scmp.ge.s32.totalorder %s2723_s5, 2  ;;  %s2109_s8 = sand.u32 1, %s2703_s24  }
 0x29a   : > { %s2110_s19 = scalar_lea.sflag [#allocation3], %s2109_s8 }
 0x29b   : > { %p2546_p9 = pnand %p2552_p7, %p2823_p8 }
 0x29d   : > { %2694 = dma.done.wait (!%p2546_p9), %s2110_s19, 2048  }
 0x29e   : > { %2696 = vsyncadd (!%p2546_p9), %s2110_s19, 4294965248  ;;  %s2119_s20 = scalar_lea.sflag [#allocation5], %s2109_s8 }
 0x29f   : > { %2698 = dma.done.wait (!%p2546_p9), %s2119_s20, 32  }
 0x2a0   : > { %2700 = vsyncadd (!%p2546_p9), %s2119_s20, 4294967264  ;;  %s24_s5 = sadd.s32 1, %s2723_s5   ;;  %s3573_s24 = smov %s2707_s25 }
 0x2a1   : > { %p21_p10 = scmp.ge.s32.totalorder %s24_s5, 4   ;;  %s3574_s25 = smov %s2711_s26 }
 0x2a2   : > { %s3575_s26 = smov %s2829_s12  ;;  %s3576_s4 = smov %s2719_s27 }
 0x2a3   : > { %s3577_s27 = smov %s3579_s30  ;;  %23 = sbr.rel (!%p21_p10) target bundleno = 6 (0x6), region = 105 }
 0x2aa   :  { %2124 = vsyncpa [#allocation3], 1 }
 0x2ab   :  { %2126 = vsyncpa [#allocation3 + $0x1], 1 }
 0x2ac   :  { %2127 = vsyncpa [#allocation5], 1 }
 0x2ad   :  { %2129 = vsyncpa [#allocation5 + $0x1], 1 }

</bundles_post_ra>
